<compile_context>
chip_gen: v5e
topology: v5e:2x2
jax: 0.10.0
libtpu: 0.0.40
codegen_flags: <defaults>
</compile_context>

<pallas_src>
import math

import jax
import jax.numpy as jnp
from jax.experimental import pallas as pl
from jax.experimental.pallas import tpu as pltpu

LN_EPS = 1e-5   # torch.nn.LayerNorm default
BIG = 1.0e6     # masking constant from the PyTorch module
_HI = jax.lax.Precision.HIGHEST


def pos_enc_kernel(slab_ref, rhs_ref, w2b_ref, pnorm_ref, eye_ref, o_ref):
    bt, n, d = o_ref.shape
    f32 = jnp.float32

    wdist = pnorm_ref[0:1, :]          # (1, D) distance weight (lanes d4:2*d4)
    gamma = pnorm_ref[1:2, :]          # (1, D) LayerNorm scale
    beta = pnorm_ref[2:3, :]           # (1, D) LayerNorm shift
    ones_rhs = jnp.ones((d, 8), f32)   # MXU RHS for the LayerNorm row-sums
    inv_d = 1.0 / d

    @pl.loop(0, bt)
    def _(i):
        slab = slab_ref[i].astype(f32)          # (N,8)=[xc,yc,zc,|c|^2,1,(1-m)BIG,m,0]
        m = slab[:, 6:7]                         # (N,1) atom mask

        # squared pairwise distances + row mask in ONE MXU pass (K=8), then the
        # constant diagonal mask (resident input) is added on the VPU.
        dm = jnp.dot(slab, rhs_ref[i].astype(f32),
                     preferred_element_type=f32) + eye_ref[...]

        # min over SQUARED distances (monotone); single sqrt on the (N,1) result.
        nearest = jnp.sqrt(jnp.maximum(jnp.min(dm, axis=-1, keepdims=True), 0.0))

        # coord/angle/dihedral projections + all biases on the MXU (same LHS slab);
        # the nearest-distance projection is one rank-1 VPU update.
        pe = jnp.dot(slab, w2b_ref[i].astype(f32),
                     preferred_element_type=f32) + nearest * wdist

        # LayerNorm over d_model; both row-sums run on the MXU (XLU offload),
        # centered two-pass variance for accuracy.
        mu = jnp.dot(pe, ones_rhs, preferred_element_type=f32)[:, 0:1] * inv_d
        ctr = pe - mu
        var = jnp.dot(ctr * ctr, ones_rhs, preferred_element_type=f32)[:, 0:1] * inv_d
        y = ctr * jax.lax.rsqrt(var + LN_EPS) * gamma + beta

        # final atom mask, single lane-dense (D = multiple of 128) store.
        o_ref[i] = (y * m).astype(o_ref.dtype)


def positional_encoding_3d(coords, atom_mask, params):
    """coords: (B, N, 3); atom_mask: (B, N) 0/1. Returns (B, N, d_model)."""
    w_coord, b_coord, w_dist, b_dist, b_angle, b_dihedral, gamma, beta = params
    B, N, _ = coords.shape
    d4 = w_coord.shape[1]
    D = 4 * d4
    f32 = jnp.float32
    out_dtype = coords.dtype

    coords = coords.astype(f32)
    mask = atom_mask.astype(f32)[..., None]                                # (B,N,1)

    # Per-molecule centroid of the valid atoms (any common shift is distance
    # invariant); centering protects the Gram trick from cancellation.
    denom = jnp.maximum(jnp.sum(mask, axis=1, keepdims=True), 1.0)
    centroid = jnp.sum(coords * mask, axis=1, keepdims=True) / denom       # (B,1,3)
    cc = coords - centroid                                                 # (B,N,3)
    sq = jnp.sum(cc * cc, axis=-1, keepdims=True)                          # (B,N,1)

    ones_c = jnp.ones((B, N, 1), f32)
    zeros_c = jnp.zeros((B, N, 1), f32)
    # Shared LHS slab for BOTH in-kernel matmuls:
    # lanes = [xc, yc, zc, ||c||^2, 1, (1-mask)*BIG, mask, 0]
    slab = jnp.concatenate(
        [cc, sq, ones_c, (1.0 - mask) * BIG, mask, zeros_c], axis=-1)      # (B,N,8)

    # RHS of the squared-distance matmul: rows = [-2xc; -2yc; -2zc; 1; ||c||^2; 1; 0; 0]
    cct = jnp.swapaxes(cc, 1, 2)                                           # (B,3,N)
    sqt = jnp.swapaxes(sq, 1, 2)                                           # (B,1,N)
    ones_r = jnp.ones((B, 1, N), f32)
    zeros_r = jnp.zeros((B, 2, N), f32)
    rhs = jnp.concatenate([-2.0 * cct, ones_r, sqt, ones_r, zeros_r], axis=1)  # (B,8,N)

    # Per-molecule projection weights: rows 0..2 = coord weights (applied to the
    # CENTERED coords), row 4 = concatenated biases with the centroid term of the
    # coord projection folded back in; other rows zero.
    comp = jnp.einsum('bk,kd->bd', centroid[:, 0, :], w_coord, precision=_HI)  # (B,d4)
    bias_b = jnp.concatenate(
        [b_coord + comp,
         jnp.broadcast_to(b_dist, (B, d4)),
         jnp.broadcast_to(b_angle, (B, d4)),
         jnp.broadcast_to(b_dihedral, (B, d4))], axis=-1)                  # (B,D)
    w2b = jnp.zeros((B, 8, D), f32)
    w2b = w2b.at[:, 0:3, 0:d4].set(w_coord)
    w2b = w2b.at[:, 4, :].set(bias_b)

    # Shared small params slab: row0 = distance weight, row1 = gamma, row2 = beta.
    wdist_row = jnp.zeros((D,), f32).at[d4:2 * d4].set(w_dist[0])
    pnorm = (jnp.zeros((8, D), f32)
             .at[0].set(wdist_row).at[1].set(gamma[0]).at[2].set(beta[0]))

    # Constant diagonal mask, fetched once (constant index map -> resident).
    eye_big = jnp.eye(N, dtype=f32) * BIG

    # Molecules per grid step: amortize the ~0.35us/step pipeline overhead while
    # keeping >= 2 grid steps (v7x has 2 TensorCores sharded via "parallel").
    bt = max(1, min(8, B // 2))
    pad = (-B) % bt
    if pad:
        slab = jnp.pad(slab, ((0, pad), (0, 0), (0, 0)))
        rhs = jnp.pad(rhs, ((0, pad), (0, 0), (0, 0)))
        w2b = jnp.pad(w2b, ((0, pad), (0, 0), (0, 0)))
    Bp = B + pad
    grid = (Bp // bt,)

    grid_spec = pltpu.PrefetchScalarGridSpec(
        num_scalar_prefetch=0,
        grid=grid,
        in_specs=[
            pl.BlockSpec((bt, N, 8), lambda b: (b, 0, 0)),
            pl.BlockSpec((bt, 8, N), lambda b: (b, 0, 0)),
            pl.BlockSpec((bt, 8, D), lambda b: (b, 0, 0)),
            pl.BlockSpec((8, D), lambda b: (0, 0)),
            pl.BlockSpec((N, N), lambda b: (0, 0)),
        ],
        out_specs=pl.BlockSpec((bt, N, D), lambda b: (b, 0, 0)),
    )

    flops = int(Bp * (18 * N * N + 36 * N * D))
    bytes_acc = int(Bp * N * (8 + 8 + D) * 4 + Bp * 8 * D * 4 + N * N * 4 + 8 * D * 4)
    cost = pl.CostEstimate(flops=flops,
                           transcendentals=int(Bp * 2 * N),
                           bytes_accessed=bytes_acc)

    out = pl.pallas_call(
        pos_enc_kernel,
        out_shape=jax.ShapeDtypeStruct((Bp, N, D), out_dtype),
        grid_spec=grid_spec,
        compiler_params=pltpu.CompilerParams(dimension_semantics=("parallel",)),
        cost_estimate=cost,
    )(slab, rhs, w2b, pnorm, eye_big)

    return out[:B] if pad else out


def init_params(key, d_model):
    """Mirror nn.Linear defaults (uniform +-1/sqrt(fan_in)); LN gamma=1, beta=0."""
    assert d_model % 4 == 0
    d4 = d_model // 4
    ks = jax.random.split(key, 6)
    lim3 = 1.0 / math.sqrt(3.0)
    lim1 = 1.0
    w_coord = jax.random.uniform(ks[0], (3, d4), jnp.float32, -lim3, lim3)
    b_coord = jax.random.uniform(ks[1], (1, d4), jnp.float32, -lim3, lim3)
    w_dist = jax.random.uniform(ks[2], (1, d4), jnp.float32, -lim1, lim1)
    b_dist = jax.random.uniform(ks[3], (1, d4), jnp.float32, -lim1, lim1)
    # angle_proj / dihedral_proj receive all-zero inputs -> only biases matter.
    b_angle = jax.random.uniform(ks[4], (1, d4), jnp.float32, -lim1, lim1)
    b_dihedral = jax.random.uniform(ks[5], (1, d4), jnp.float32, -lim1, lim1)
    gamma = jnp.ones((1, d_model), jnp.float32)
    beta = jnp.zeros((1, d_model), jnp.float32)
    return (w_coord, b_coord, w_dist, b_dist, b_angle, b_dihedral, gamma, beta)


def reference(coords, atom_mask, params):
    """Pure-JAX mirror of the PyTorch forward (f32-exact dot)."""
    w_coord, b_coord, w_dist, b_dist, b_angle, b_dihedral, gamma, beta = params
    B, N, _ = coords.shape
    d4 = w_coord.shape[1]
    coord_enc = jnp.einsum('bnk,kd->bnd', coords, w_coord, precision=_HI) + b_coord
    diff = coords[:, :, None, :] - coords[:, None, :, :]
    dist = jnp.sqrt(jnp.maximum(jnp.sum(diff * diff, axis=-1), 0.0))       # (B,N,N)
    dist = dist + (1.0 - atom_mask[..., None]) * BIG
    dist = dist + jnp.eye(N, dtype=coords.dtype) * BIG
    nearest = jnp.min(dist, axis=-1)                                       # (B,N)
    dist_enc = nearest[..., None] * w_dist + b_dist                        # (B,N,d4)
    angle_enc = jnp.broadcast_to(b_angle, (B, N, d4))
    dihedral_enc = jnp.broadcast_to(b_dihedral, (B, N, d4))
    pe = jnp.concatenate([coord_enc, dist_enc, angle_enc, dihedral_enc], axis=-1)
    mu = jnp.mean(pe, axis=-1, keepdims=True)
    var = jnp.mean((pe - mu) ** 2, axis=-1, keepdims=True)
    pe = (pe - mu) * jax.lax.rsqrt(var + LN_EPS) * gamma + beta
    return pe * atom_mask[..., None]


if __name__ == "__main__":
    key = jax.random.PRNGKey(0)
    kp, kc1, kc2 = jax.random.split(key, 3)

    d_model, max_atoms = 128, 128
    params = init_params(kp, d_model)

    # Case 1: batch=2 -> bt=1, grid=(2,).  Non-centered coords exercise the
    # centroid-compensated Gram-trick path.
    coords1 = (jax.random.normal(kc1, (2, max_atoms, 3), jnp.float32) * 2.0
               + jnp.array([12.0, -7.0, 9.0], jnp.float32))
    nvalid1 = jnp.array([100, 80])
    mask1 = (jnp.arange(max_atoms)[None, :] < nvalid1[:, None]).astype(jnp.float32)

    out1 = positional_encoding_3d(coords1, mask1, params)
    jax.block_until_ready(out1)
    ref1 = reference(coords1, mask1, params)
    err1 = float(jnp.max(jnp.abs(out1 - ref1)))
    assert jnp.allclose(out1, ref1, atol=1e-4, rtol=1e-4), f"case1 mismatch (max abs err {err1})"

    # Case 2: batch=5 -> bt=2 (one padded molecule), grid=(3,): exercises the
    # multi-molecule-per-step loop and batch padding.
    coords2 = (jax.random.normal(kc2, (5, max_atoms, 3), jnp.float32) * 1.5
               + jnp.array([-4.0, 25.0, 3.0], jnp.float32))
    nvalid2 = jnp.array([128, 60, 3, 90, 17])
    mask2 = (jnp.arange(max_atoms)[None, :] < nvalid2[:, None]).astype(jnp.float32)

    out2 = positional_encoding_3d(coords2, mask2, params)
    jax.block_until_ready(out2)
    ref2 = reference(coords2, mask2, params)
    err2 = float(jnp.max(jnp.abs(out2 - ref2)))
    assert jnp.allclose(out2, ref2, atol=1e-4, rtol=1e-4), f"case2 mismatch (max abs err {err2})"

    print("KERNEL_OK")
</pallas_src>

<mosaic_0001>
module attributes {stable_mosaic.version = 11 : i64} {
  func.func @pos_enc_kernel(%arg0: i32, %arg1: memref<1x128x8xf32, #tpu.memory_space<vmem>>, %arg2: memref<1x8x128xf32, #tpu.memory_space<vmem>>, %arg3: memref<1x8x128xf32, #tpu.memory_space<vmem>>, %arg4: memref<8x128xf32, #tpu.memory_space<vmem>>, %arg5: memref<128x128xf32, #tpu.memory_space<vmem>>, %arg6: memref<1x128x128xf32, #tpu.memory_space<vmem>>) attributes {dimension_semantics = [#tpu.dimension_semantics<parallel>], iteration_bounds = array<i64: 2>, scalar_prefetch = 0 : i64, scratch_operands = 0 : i64, tpu.core_type = #tpu.core_type<tc>, window_params = [{transform_indices = @transform_0, window_bounds = array<i64: 1, 128, 8>}, {transform_indices = @transform_1, window_bounds = array<i64: 1, 8, 128>}, {transform_indices = @transform_2, window_bounds = array<i64: 1, 8, 128>}, {pipeline_mode = #tpu.pipeline_mode<synchronous>, transform_indices = @transform_3, window_bounds = array<i64: 8, 128>}, {pipeline_mode = #tpu.pipeline_mode<synchronous>, transform_indices = @transform_4, window_bounds = array<i64: 128, 128>}, {transform_indices = @transform_5, window_bounds = array<i64: 1, 128, 128>}]} {
    %c0 = arith.constant 0 : index
    %c0_0 = arith.constant 0 : index
    %0 = vector.load %arg4[%c0, %c0_0] : memref<8x128xf32, #tpu.memory_space<vmem>>, vector<1x128xf32>
    %c1 = arith.constant 1 : index
    %c0_1 = arith.constant 0 : index
    %1 = vector.load %arg4[%c1, %c0_1] : memref<8x128xf32, #tpu.memory_space<vmem>>, vector<1x128xf32>
    %c2 = arith.constant 2 : index
    %c0_2 = arith.constant 0 : index
    %2 = vector.load %arg4[%c2, %c0_2] : memref<8x128xf32, #tpu.memory_space<vmem>>, vector<1x128xf32>
    %cst = arith.constant 1.000000e+00 : f32
    %3 = vector.broadcast %cst : f32 to vector<128x8xf32>
    %c0_i32 = arith.constant 0 : i32
    %c1_i32 = arith.constant 1 : i32
    %4 = arith.muli %c0_i32, %c1_i32 : i32
    %c0_i32_3 = arith.constant 0 : i32
    %5 = arith.addi %c0_i32_3, %4 : i32
    %6 = arith.index_cast %5 : i32 to index
    %c0_4 = arith.constant 0 : index
    %c0_5 = arith.constant 0 : index
    %7 = vector.load %arg1[%6, %c0_4, %c0_5] : memref<1x128x8xf32, #tpu.memory_space<vmem>>, vector<1x128x8xf32>
    %8 = vector.shape_cast %7 : vector<1x128x8xf32> to vector<128x8xf32>
    %9 = vector.extract_strided_slice %8 {offsets = [0, 6], sizes = [128, 1], strides = [1, 1]} : vector<128x8xf32> to vector<128x1xf32>
    %10 = arith.index_cast %5 : i32 to index
    %c0_6 = arith.constant 0 : index
    %c0_7 = arith.constant 0 : index
    %11 = vector.load %arg2[%10, %c0_6, %c0_7] : memref<1x8x128xf32, #tpu.memory_space<vmem>>, vector<1x8x128xf32>
    %12 = vector.shape_cast %11 : vector<1x8x128xf32> to vector<8x128xf32>
    %cst_8 = arith.constant dense<0.000000e+00> : vector<128x128xf32>
    %13 = tpu.matmul %8, %12, %cst_8 {dimension_numbers = #tpu.dot_dimension_numbers<[1], [0], [0], [1], [0, 0, 1, 1], [], []>} : vector<128x8xf32>, vector<8x128xf32>, vector<128x128xf32> -> vector<128x128xf32>
    %c0_9 = arith.constant 0 : index
    %c0_10 = arith.constant 0 : index
    %14 = vector.load %arg5[%c0_9, %c0_10] : memref<128x128xf32, #tpu.memory_space<vmem>>, vector<128x128xf32>
    %15 = arith.addf %13, %14 : vector<128x128xf32>
    %cst_11 = arith.constant dense<0x7F800000> : vector<128xf32>
    %16 = vector.multi_reduction <minimumf>, %15, %cst_11 [1] : vector<128x128xf32> to vector<128xf32>
    %17 = vector.shape_cast %16 : vector<128xf32> to vector<128x1xf32>
    %cst_12 = arith.constant 0.000000e+00 : f32
    %18 = vector.broadcast %cst_12 : f32 to vector<128x1xf32>
    %19 = arith.maximumf %17, %18 : vector<128x1xf32>
    %20 = math.sqrt %19 : vector<128x1xf32>
    %21 = arith.index_cast %5 : i32 to index
    %c0_13 = arith.constant 0 : index
    %c0_14 = arith.constant 0 : index
    %22 = vector.load %arg3[%21, %c0_13, %c0_14] : memref<1x8x128xf32, #tpu.memory_space<vmem>>, vector<1x8x128xf32>
    %23 = vector.shape_cast %22 : vector<1x8x128xf32> to vector<8x128xf32>
    %cst_15 = arith.constant dense<0.000000e+00> : vector<128x128xf32>
    %24 = tpu.matmul %8, %23, %cst_15 {dimension_numbers = #tpu.dot_dimension_numbers<[1], [0], [0], [1], [0, 0, 1, 1], [], []>} : vector<128x8xf32>, vector<8x128xf32>, vector<128x128xf32> -> vector<128x128xf32>
    %25 = vector.broadcast %20 : vector<128x1xf32> to vector<128x128xf32>
    %26 = vector.broadcast %0 : vector<1x128xf32> to vector<128x128xf32>
    %27 = arith.mulf %25, %26 : vector<128x128xf32>
    %28 = arith.addf %24, %27 : vector<128x128xf32>
    %cst_16 = arith.constant dense<0.000000e+00> : vector<128x8xf32>
    %29 = tpu.matmul %28, %3, %cst_16 {dimension_numbers = #tpu.dot_dimension_numbers<[1], [0], [0], [1], [0, 0, 1, 1], [], []>} : vector<128x128xf32>, vector<128x8xf32>, vector<128x8xf32> -> vector<128x8xf32>
    %30 = vector.extract_strided_slice %29 {offsets = [0, 0], sizes = [128, 1], strides = [1, 1]} : vector<128x8xf32> to vector<128x1xf32>
    %cst_17 = arith.constant 7.812500e-03 : f32
    %31 = vector.broadcast %cst_17 : f32 to vector<128x1xf32>
    %32 = arith.mulf %30, %31 : vector<128x1xf32>
    %33 = vector.broadcast %32 : vector<128x1xf32> to vector<128x128xf32>
    %34 = arith.subf %28, %33 : vector<128x128xf32>
    %35 = arith.mulf %34, %34 : vector<128x128xf32>
    %cst_18 = arith.constant dense<0.000000e+00> : vector<128x8xf32>
    %36 = tpu.matmul %35, %3, %cst_18 {dimension_numbers = #tpu.dot_dimension_numbers<[1], [0], [0], [1], [0, 0, 1, 1], [], []>} : vector<128x128xf32>, vector<128x8xf32>, vector<128x8xf32> -> vector<128x8xf32>
    %37 = vector.extract_strided_slice %36 {offsets = [0, 0], sizes = [128, 1], strides = [1, 1]} : vector<128x8xf32> to vector<128x1xf32>
    %cst_19 = arith.constant 7.812500e-03 : f32
    %38 = vector.broadcast %cst_19 : f32 to vector<128x1xf32>
    %39 = arith.mulf %37, %38 : vector<128x1xf32>
    %cst_20 = arith.constant 9.99999974E-6 : f32
    %40 = vector.broadcast %cst_20 : f32 to vector<128x1xf32>
    %41 = arith.addf %39, %40 : vector<128x1xf32>
    %42 = math.rsqrt %41 : vector<128x1xf32>
    %43 = vector.broadcast %42 : vector<128x1xf32> to vector<128x128xf32>
    %44 = arith.mulf %34, %43 : vector<128x128xf32>
    %45 = vector.broadcast %1 : vector<1x128xf32> to vector<128x128xf32>
    %46 = arith.mulf %44, %45 : vector<128x128xf32>
    %47 = vector.broadcast %2 : vector<1x128xf32> to vector<128x128xf32>
    %48 = arith.addf %46, %47 : vector<128x128xf32>
    %49 = vector.broadcast %9 : vector<128x1xf32> to vector<128x128xf32>
    %50 = arith.mulf %48, %49 : vector<128x128xf32>
    %51 = arith.index_cast %5 : i32 to index
    %c0_21 = arith.constant 0 : index
    %c0_22 = arith.constant 0 : index
    %52 = vector.load %arg6[%51, %c0_21, %c0_22] : memref<1x128x128xf32, #tpu.memory_space<vmem>>, vector<1x128x128xf32>
    %53 = vector.shape_cast %52 : vector<1x128x128xf32> to vector<128x128xf32>
    %54 = vector.shape_cast %50 : vector<128x128xf32> to vector<1x128x128xf32>
    tpu.vector_store %arg6[%51, %c0_21, %c0_22], %54 {strides = array<i32>} : memref<1x128x128xf32, #tpu.memory_space<vmem>>, vector<1x128x128xf32>,
    %c1_i32_23 = arith.constant 1 : i32
    return
  }
  func.func @transform_0(%arg0: i32) -> (i32, i32, i32) {
    %c0_i32 = arith.constant 0 : i32
    %c0_i32_0 = arith.constant 0 : i32
    %c0_i32_1 = arith.constant 0 : i32
    return %arg0, %c0_i32, %c0_i32_0 : i32, i32, i32
  }
  func.func @transform_1(%arg0: i32) -> (i32, i32, i32) {
    %c0_i32 = arith.constant 0 : i32
    %c0_i32_0 = arith.constant 0 : i32
    %c0_i32_1 = arith.constant 0 : i32
    return %arg0, %c0_i32, %c0_i32_0 : i32, i32, i32
  }
  func.func @transform_2(%arg0: i32) -> (i32, i32, i32) {
    %c0_i32 = arith.constant 0 : i32
    %c0_i32_0 = arith.constant 0 : i32
    %c0_i32_1 = arith.constant 0 : i32
    return %arg0, %c0_i32, %c0_i32_0 : i32, i32, i32
  }
  func.func @transform_3(%arg0: i32) -> (i32, i32) {
    %c0_i32 = arith.constant 0 : i32
    %c0_i32_0 = arith.constant 0 : i32
    %c0_i32_1 = arith.constant 0 : i32
    return %c0_i32, %c0_i32_0 : i32, i32
  }
  func.func @transform_4(%arg0: i32) -> (i32, i32) {
    %c0_i32 = arith.constant 0 : i32
    %c0_i32_0 = arith.constant 0 : i32
    %c0_i32_1 = arith.constant 0 : i32
    return %c0_i32, %c0_i32_0 : i32, i32
  }
  func.func @transform_5(%arg0: i32) -> (i32, i32, i32) {
    %c0_i32 = arith.constant 0 : i32
    %c0_i32_0 = arith.constant 0 : i32
    %c0_i32_1 = arith.constant 0 : i32
    return %arg0, %c0_i32, %c0_i32_0 : i32, i32, i32
  }
}

</mosaic_0001>

<bundles_post_ra>
// kernel: tpu_custom_call.1
= control target key start
LH: loop header
LB: loop body
LE: loop exit
PB: predicated region body
PF: predicated region fallthrough
CT: control target
= control target key end

     0   :  { %10 = vsyncpa [#allocation3], 0  ;;  %s2451_s0 = inlined_call_operand.vmem [shape: f32[2,128,8], index: 0, kind: input, shape index: {}]   ;;  %s2452_s1 = inlined_call_operand.vmem [shape: f32[2,8,128], index: 1, kind: input, shape index: {}]   ;;  %s2453_s2 = inlined_call_operand.vmem [shape: f32[2,8,128], index: 2, kind: input, shape index: {}]   ;;  %s2454_s3 = inlined_call_operand.vmem [shape: f32[8,128], index: 3, kind: input, shape index: {}]   ;;  %s2455_s4 = inlined_call_operand.vmem [shape: f32[128,128], index: 4, kind: input, shape index: {}]   ;;  %s2456_s5 = inlined_call_operand.hbm [shape: f32[2,128,128], index: 5, kind: output, shape index: {}]  }
   0x1   :  { %12 = vsyncpa [#allocation3 + $0x1], 0  ;;  %s1826_s18 = smov 0   ;;  %s1828_s19 = smov 0  }
   0x2   :  { %s1830_s20 = smov 0   ;;  %s1832_s21 = smov 0  }
   0x3 LB: > { %s1847_s22 = sadd.s32 4294967295, %s1789_s21   ;;  %s1508_s23 = sadd.s32 4294967294, %s1789_s21   ;;  %s1789_s21 = sphi %s1832_s21, %s2462_s21   ;;  %s1785_s20 = sphi %s1830_s20, %s2461_s20   ;;  %s1781_s19 = sphi %s1828_s19, %s2460_s19   ;;  %s1777_s18 = sphi %s1826_s18, %s2459_s18  }
   0x4   : > { %s1851_s24 = sadd.s32 1, %s1789_s21   ;;  %s145_s25 = sadd.s32 1, %s1785_s20 }
   0x5   : > { %s142_s26 = ssub.s32 %s1789_s21, %s1851_s24  ;;  %p155_p0 = scmp.ne.s32.totalorder %s1785_s20, %s1781_s19 }
   0x6   : > { %p143_p1 = scmp.eq.s32.totalorder %s142_s26, 0  ;;  %p156_p2 = scmp.eq.s32.totalorder %s1847_s22, 1 }
   0x7   : > { %p161_p3 = scmp.ne.s32.totalorder %s1781_s19, %s1777_s18  ;;  %p162_p4 = scmp.eq.s32.totalorder %s1508_s23, 1 }
   0x8   : > { %s1862_s27 = scalar_select %p143_p1, %s1785_s20, %s145_s25  }
   0x9   : > { %p1864_p5 = por %p156_p2, %p155_p0  ;;  %p1868_p6 = por %p162_p4, %p161_p3 }
   0xa   : > { %p1511_p7 = scmp.ge.s32.totalorder %s1789_s21, 1  ;;  %p208_p8 = scmp.lt.s32.totalorder %s1789_s21, 3 }
   0xc   : > { %p209_p9 = pnand %p1511_p7, %p208_p8 }
   0xd   : > { %p244_p10 = scmp.lt.s32.totalorder (!%p209_p9), %s1847_s22, 1 }
   0xe   : > { %212 = sbr.rel (%p209_p9) target bundleno = 955 (0x3bb), region = 40 }
  0x13   : > { %s1876_s30 = scalar_select %p244_p10, %s1847_s22, 1  ;;  %vm293_vm0 = vcmask 64512   ;;  %v278_v19 = vld [vmem:[%s2455_s4 + $0x8] sm:$0xff]  ;;  %v279_v22 = vld [vmem:[%s2455_s4 + $0x10] sm:$0xff]  ;;  %v280_v25 = vld [vmem:[%s2455_s4 + $0x18] sm:$0xff]  ;;  %v1791_v52 = vmov 1.0  }
  0x14   : > { %v281_v28 = vld [vmem:[%s2455_s4 + $0x20] sm:$0xff]  ;;  %v282_v31 = vld [vmem:[%s2455_s4 + $0x28] sm:$0xff]  ;;  %v283_v34 = vld [vmem:[%s2455_s4 + $0x30] sm:$0xff]  ;;  %1556 = vmatpush.msra.mxu2 %v1791_v52  ;;  %1572 = vmatpush.msra.mxu3 %v1791_v52 }
  0x15   : > { %s1554_s6 = sshll.u32 %s1876_s30, 7  ;;  %s1515_s7 = sshll.u32 %s1876_s30, 3  ;;  %v284_v37 = vld [vmem:[%s2455_s4 + $0x38] sm:$0xff]  ;;  %v285_v40 = vld [vmem:[%s2455_s4 + $0x40] sm:$0xff]  ;;  %v286_v43 = vld [vmem:[%s2455_s4 + $0x48] sm:$0xff] }
  0x16   : > { %s1883_s10 = scalar_lea.vmem %s2451_s0, %s1554_s6  ;;  %s252_s13 = scalar_lea.vmem %s2452_s1, %s1515_s7  ;;  %v287_v46 = vld [vmem:[%s2455_s4 + $0x50] sm:$0xff]  ;;  %v288_v49 = vld [vmem:[%s2455_s4 + $0x58] sm:$0xff]  ;;  %1557 = vmatpush.msra.mxu2 %v1791_v52  ;;  %v289_v53 = vld [vmem:[%s2455_s4 + $0x60] sm:$0xff]  ;;  %1573 = vmatpush.msra.mxu3 %v1791_v52 }
  0x17   : > { %v276_v0 = vld [vmem:[%s252_s13] sm:$0xff]  ;;  %v261_v2 = vld [vmem:[%s1883_s10 + $0x8] sm:$0xff]  ;;  %v262_v3 = vld [vmem:[%s1883_s10 + $0x10] sm:$0xff]  ;;  %s256_s16 = scalar_lea.vmem %s2453_s2, %s1515_s7  ;;  %s241_s7 = sand.u32 1, %s1781_s19  }
  0x18   : > { %v260_v1 = vld [vmem:[%s1883_s10] sm:$0xff]  ;;  %357 = vmatpush.msra.mxu0 %v276_v0  ;;  %v263_v4 = vld [vmem:[%s1883_s10 + $0x18] sm:$0xff]  ;;  %v265_v6 = vld [vmem:[%s1883_s10 + $0x28] sm:$0xff]  ;;  %1558 = vmatpush.msra.mxu2 %v1791_v52  ;;  %s1512_s11 = sshll.u32 %s241_s7, 7  ;;  %s1747_s6 = scalar_lea.hbm %s2456_s5, 256 }
  0x19   : > { %1517 = vmatmul.msk.f32.vlgmr.msra.gmra.mxu0 %vm293_vm0, %v260_v1  ;;  %v264_v5 = vld [vmem:[%s1883_s10 + $0x20] sm:$0xff]  ;;  %v266_v7 = vld [vmem:[%s1883_s10 + $0x30] sm:$0xff]  ;;  %v267_v8 = vld [vmem:[%s1883_s10 + $0x38] sm:$0xff]  ;;  %1574 = vmatpush.msra.mxu3 %v1791_v52  ;;  %s2342_s12 = scalar_lea.vmem [#allocation2], %s1512_s11 }
  0x1a   : > { %v268_v9 = vld [vmem:[%s1883_s10 + $0x40] sm:$0xff]  ;;  %v269_v10 = vld [vmem:[%s1883_s10 + $0x48] sm:$0xff]  ;;  %v270_v11 = vld [vmem:[%s1883_s10 + $0x50] sm:$0xff]  ;;  %730 = vmatpush.msrb.mxu0 %v1791_v52  ;;  %1559 = vmatpush.msra.mxu2 %v1791_v52 }
  0x1b   : > { %v271_v12 = vld [vmem:[%s1883_s10 + $0x58] sm:$0xff]  ;;  %v1915_v13 = vld [vmem:[%s1883_s10 + $0x60] sm:$0xff]  ;;  %v1920_v14 = vld [vmem:[%s1883_s10 + $0x68] sm:$0xff]  ;;  %1575 = vmatpush.msra.mxu3 %v1791_v52 }
  0x1c   : > { %v1930_v15 = vld [vmem:[%s1883_s10 + $0x70] sm:$0xff]  ;;  %v647_v16 = vld [vmem:[%s256_s16] sm:$0xff]  ;;  %v1936_v17 = vld [vmem:[%s1883_s10 + $0x78] sm:$0xff]  ;;  %731 = vmatpush.msrb.mxu0 %v1791_v52  ;;  %1560 = vmatpush.msra.mxu2 %v1791_v52  ;;  %s1419_s16 = sshll.u32 %s2342_s12, 4  ;;  %s1420_s16 = int_to_ptr.vmem [resolvable:$true] %s1419_s16 }
  0x1d   : > { %680 = vmatpush.msra.mxu1 %v647_v16  ;;  %v290_v56 = vld [vmem:[%s2455_s4 + $0x68] sm:$0xff]  ;;  %1576 = vmatpush.msra.mxu3 %v1791_v52  ;;  %v277_v59 = vld [vmem:[%s2455_s4] sm:$0xff]  ;;  %v291_v60 = vld [vmem:[%s2455_s4 + $0x70] sm:$0xff] }
  0x1e   : > { %1533 = vmatmul.msk.f32.vlgmr.msra.gmra.mxu1 %vm293_vm0, %v260_v1  ;;  %732 = vmatpush.msrb.mxu0 %v1791_v52  ;;  %v292_v1 = vld [vmem:[%s2455_s4 + $0x78] sm:$0xff] }
  0x1f   : > { %923 = vmatpush.msrb.mxu1 %v1791_v52  ;;  %1561 = vmatpush.msra.mxu2 %v1791_v52 }
  0x20   : > { %733 = vmatpush.msrb.mxu0 %v1791_v52  ;;  %1577 = vmatpush.msra.mxu3 %v1791_v52 }
  0x21   : > { %1518 = vmatmul.msk.f32.gmra.mxu0 %vm293_vm0, %v261_v2  ;;  %924 = vmatpush.msrb.mxu1 %v1791_v52 }
  0x22   : > { %734 = vmatpush.msrb.mxu0 %v1791_v52  ;;  %1562 = vmatpush.msra.mxu2 %v1791_v52 }
  0x23   : > { %925 = vmatpush.msrb.mxu1 %v1791_v52  ;;  %1578 = vmatpush.msra.mxu3 %v1791_v52 }
  0x24   : > { %735 = vmatpush.msrb.mxu0 %v1791_v52  ;;  %1563 = vmatpush.msra.mxu2 %v1791_v52 }
  0x25   : > { %926 = vmatpush.msrb.mxu1 %v1791_v52  ;;  %1579 = vmatpush.msra.mxu3 %v1791_v52 }
  0x26   : > { %1534 = vmatmul.msk.f32.gmra.mxu1 %vm293_vm0, %v261_v2  ;;  %736 = vmatpush.msrb.mxu0 %v1791_v52 }
  0x27   : > { %927 = vmatpush.msrb.mxu1 %v1791_v52  ;;  %1564 = vmatpush.msra.mxu2 %v1791_v52 }
  0x28   : > { %737 = vmatpush.msrb.mxu0 %v1791_v52  ;;  %1580 = vmatpush.msra.mxu3 %v1791_v52 }
  0x29   : > { %1519 = vmatmul.msk.f32.gmra.mxu0 %vm293_vm0, %v262_v3  ;;  %928 = vmatpush.msrb.mxu1 %v1791_v52 }
  0x2a   : > { %738 = vmatpush.msrb.mxu0 %v1791_v52  ;;  %1565 = vmatpush.msra.mxu2 %v1791_v52 }
  0x2b   : > { %929 = vmatpush.msrb.mxu1 %v1791_v52  ;;  %1581 = vmatpush.msra.mxu3 %v1791_v52 }
  0x2c   : > { %739 = vmatpush.msrb.mxu0 %v1791_v52  ;;  %1566 = vmatpush.msra.mxu2 %v1791_v52 }
  0x2d   : > { %930 = vmatpush.msrb.mxu1 %v1791_v52  ;;  %1582 = vmatpush.msra.mxu3 %v1791_v52 }
  0x2e   : > { %1535 = vmatmul.msk.f32.gmra.mxu1 %vm293_vm0, %v262_v3  ;;  %740 = vmatpush.msrb.mxu0 %v1791_v52 }
  0x2f   : > { %1567 = vmatpush.msra.mxu2 %v1791_v52  ;;  %931 = vmatpush.msrb.mxu1 %v1791_v52 }
  0x30   : > { %741 = vmatpush.msrb.mxu0 %v1791_v52  ;;  %1583 = vmatpush.msra.mxu3 %v1791_v52 }
  0x31   : > { %1520 = vmatmul.msk.f32.gmra.mxu0 %vm293_vm0, %v263_v4  ;;  %1568 = vmatpush.msra.mxu2 %v1791_v52 }
  0x32   : > { %742 = vmatpush.msrb.mxu0 %v1791_v52  ;;  %932 = vmatpush.msrb.mxu1 %v1791_v52 }
  0x33   : > { %1569 = vmatpush.msra.mxu2 %v1791_v52  ;;  %1584 = vmatpush.msra.mxu3 %v1791_v52 }
  0x34   : > { %743 = vmatpush.msrb.mxu0 %v1791_v52  ;;  %933 = vmatpush.msrb.mxu1 %v1791_v52 }
  0x35   : > { %1570 = vmatpush.msra.mxu2 %v1791_v52  ;;  %1585 = vmatpush.msra.mxu3 %v1791_v52 }
  0x36   : > { %1536 = vmatmul.msk.f32.gmra.mxu1 %vm293_vm0, %v263_v4  ;;  %744 = vmatpush.msrb.mxu0 %v1791_v52 }
  0x37   : > { %1571 = vmatpush.msra.mxu2 %v1791_v52  ;;  %934 = vmatpush.msrb.mxu1 %v1791_v52 }
  0x38   : > { %745 = vmatpush.msrb.mxu0 %v1791_v52  ;;  %1586 = vmatpush.msra.mxu3 %v1791_v52 }
  0x39   : > { %1521 = vmatmul.msk.f32.gmra.mxu0 %vm293_vm0, %v264_v5  ;;  %935 = vmatpush.msrb.mxu1 %v1791_v52 }
  0x3a   : > { %1587 = vmatpush.msra.mxu3 %v1791_v52 }
  0x3b   : > { %936 = vmatpush.msrb.mxu1 %v1791_v52 }
  0x3d   : > { %937 = vmatpush.msrb.mxu1 %v1791_v52 }
  0x3e   : > { %1537 = vmatmul.msk.f32.gmra.mxu1 %vm293_vm0, %v264_v5 }
  0x3f   : > { %938 = vmatpush.msrb.mxu1 %v1791_v52 }
  0x41   : > { %1522 = vmatmul.msk.f32.gmra.mxu0 %vm293_vm0, %v265_v6 }
  0x46   : > { %1538 = vmatmul.msk.f32.gmra.mxu1 %vm293_vm0, %v265_v6 }
  0x49   : > { %1523 = vmatmul.msk.f32.gmra.mxu0 %vm293_vm0, %v266_v7 }
  0x4e   : > { %1539 = vmatmul.msk.f32.gmra.mxu1 %vm293_vm0, %v266_v7 }
  0x51   : > { %1524 = vmatmul.msk.f32.gmra.mxu0 %vm293_vm0, %v267_v8 }
  0x56   : > { %1540 = vmatmul.msk.f32.gmra.mxu1 %vm293_vm0, %v267_v8 }
  0x59   : > { %1525 = vmatmul.msk.f32.gmra.mxu0 %vm293_vm0, %v268_v9 }
  0x5e   : > { %1541 = vmatmul.msk.f32.gmra.mxu1 %vm293_vm0, %v268_v9 }
  0x61   : > { %1526 = vmatmul.msk.f32.gmra.mxu0 %vm293_vm0, %v269_v10 }
  0x66   : > { %1542 = vmatmul.msk.f32.gmra.mxu1 %vm293_vm0, %v269_v10 }
  0x69   : > { %1527 = vmatmul.msk.f32.gmra.mxu0 %vm293_vm0, %v270_v11 }
  0x6e   : > { %1543 = vmatmul.msk.f32.gmra.mxu1 %vm293_vm0, %v270_v11 }
  0x71   : > { %1528 = vmatmul.msk.f32.gmra.mxu0 %vm293_vm0, %v271_v12 }
  0x76   : > { %1544 = vmatmul.msk.f32.gmra.mxu1 %vm293_vm0, %v271_v12 }
  0x79   : > { %1529 = vmatmul.msk.f32.gmra.mxu0 %vm293_vm0, %v1915_v13 }
  0x7e   : > { %1545 = vmatmul.msk.f32.gmra.mxu1 %vm293_vm0, %v1915_v13 }
  0x81   : > { %1530 = vmatmul.msk.f32.gmra.mxu0 %vm293_vm0, %v1920_v14 }
  0x86   : > { %1546 = vmatmul.msk.f32.gmra.mxu1 %vm293_vm0, %v1920_v14 }
  0x89   : > { %1531 = vmatmul.msk.f32.gmra.mxu0 %vm293_vm0, %v1930_v15 }
  0x8e   : > { %1547 = vmatmul.msk.f32.gmra.mxu1 %vm293_vm0, %v1930_v15 }
  0x91   : > { %1532 = vmatmul.msk.f32.gmra.mxu0 %vm293_vm0, %v1936_v17 }
  0x96   : > { %v1941_v18 = vpop.f32.mrf.mxu0  ;;  %1548 = vmatmul.msk.f32.gmra.mxu1 %vm293_vm0, %v1936_v17 }
  0x97   : > { %v360_v63 = vadd.f32 %v1941_v18, %v277_v59 }
  0x9b   : > { %v2042_v61 = vpop.f32.mrf.mxu1 }
  0x9e   : > { %v362_v20 = vpop.f32.mrf.mxu0 }
  0x9f   : > { %v363_v21 = vadd.f32 %v362_v20, %v278_v19 }
  0xa1   : > { %409 = vmin.xlane.f32.xlu0 %v363_v21 }
  0xa3   : > { %v685_v4 = vpop.f32.mrf.mxu1 }
  0xa6   : > { %v365_v23 = vpop.f32.mrf.mxu0 }
  0xa7   : > { %v366_v24 = vadd.f32 %v365_v23, %v279_v22  ;;  %v2079_v22 = vld [vmem:[%s2454_s3] ss:$0 sm:$0xff] }
  0xa9   : > { %411 = vmin.xlane.f32.xlu0 %v366_v24 }
  0xab   : > { %v688_v7 = vpop.f32.mrf.mxu1 }
  0xae   : > { %v368_v26 = vpop.f32.mrf.mxu0 }
  0xaf   : > { %v369_v27 = vadd.f32 %v368_v26, %v280_v25 }
  0xb1   : > { %413 = vmin.xlane.f32.xlu1 %v369_v27 }
  0xb3   : > { %v691_v14 = vpop.f32.mrf.mxu1 }
  0xb6   : > { %v371_v29 = vpop.f32.mrf.mxu0 }
  0xb7   : > { %v372_v30 = vadd.f32 %v371_v29, %v281_v28 }
  0xb9   : > { %415 = vmin.xlane.f32.xlu1 %v372_v30 }
  0xbe   : > { %v374_v32 = vpop.f32.mrf.mxu0 }
  0xbf   : > { %v375_v33 = vadd.f32 %v374_v32, %v282_v31 }
  0xc1   : > { %417 = vmin.xlane.f32.xlu2 %v375_v33  ;;  %v694_v33 = vpop.f32.mrf.mxu1 }
  0xc6   : > { %v377_v35 = vpop.f32.mrf.mxu0 }
  0xc7   : > { %v378_v36 = vadd.f32 %v377_v35, %v283_v34 }
  0xc9   : > { %419 = vmin.xlane.f32.xlu2 %v378_v36 }
  0xce   : > { %v380_v38 = vpop.f32.mrf.mxu0 }
  0xcf   : > { %v381_v39 = vadd.f32 %v380_v38, %v284_v37 }
  0xd1   : > { %421 = vmin.xlane.f32.xlu0 %v381_v39 }
  0xd6   : > { %v383_v41 = vpop.f32.mrf.mxu0 }
  0xd7   : > { %v384_v42 = vadd.f32 %v383_v41, %v285_v40 }
  0xd9   : > { %423 = vmin.xlane.f32.xlu1 %v384_v42 }
  0xde   : > { %v386_v44 = vpop.f32.mrf.mxu0 }
  0xdf   : > { %v387_v45 = vadd.f32 %v386_v44, %v286_v43 }
  0xe1   : > { %425 = vmin.xlane.f32.xlu2 %v387_v45 }
  0xe6   : > { %v389_v47 = vpop.f32.mrf.mxu0 }
  0xe7   : > { %v390_v48 = vadd.f32 %v389_v47, %v287_v46 }
  0xe9   : > { %427 = vmin.xlane.f32.xlu0 %v390_v48 }
  0xee   : > { %v392_v50 = vpop.f32.mrf.mxu0 }
  0xef   : > { %v393_v51 = vadd.f32 %v392_v50, %v288_v49 }
  0xf1   : > { %429 = vmin.xlane.f32.xlu1 %v393_v51  ;;  %v697_v51 = vpop.f32.mrf.mxu1 }
  0xf6   : > { %v395_v54 = vpop.f32.mrf.mxu0 }
  0xf7   : > { %v396_v55 = vadd.f32 %v395_v54, %v289_v53 }
  0xf9   : > { %431 = vmin.xlane.f32.xlu2 %v396_v55 }
  0xfe   : > { %v398_v57 = vpop.f32.mrf.mxu0 }
  0xff   : > { %v399_v58 = vadd.f32 %v398_v57, %v290_v56 }
 0x101   : > { %433 = vmin.xlane.f32.xlu0 %v399_v58 }
 0x106   : > { %v401_v62 = vpop.f32.mrf.mxu0 }
 0x107   : > { %v402_v0 = vadd.f32 %v401_v62, %v291_v60 }
 0x109   : > { %435 = vmin.xlane.f32.xlu1 %v402_v0  ;;  %407 = vmin.xlane.f32.xlu0 %v360_v63 }
 0x10e   : > { %v404_v2 = vpop.f32.mrf.mxu0 }
 0x10f   : > { %v405_v3 = vadd.f32 %v404_v2, %v292_v1 }
 0x111   : > { %437 = vmin.xlane.f32.xlu2 %v405_v3 }
 0x114   : > { %v410_v5 = vpop.xlane.xlu0 %409 }
 0x115   : > { %v440_v6 = vmax.f32 %v410_v5, 0.0 }
 0x117   : > { %1647 = vrsqrt.f32 %v440_v6  ;;  %vm474_vm1 = vcmp.eq.f32.partialorder %v440_v6, inf  ;;  %v477_v24 = vand.u32 2147483648, %v440_v6  ;;  %vm476_vm2 = vcmp.eq.f32.partialorder %v440_v6, 0.0 }
 0x11c   : > { %v412_v8 = vpop.xlane.xlu0 %411 }
 0x11d   : > { %v1648_v9 = vpop.eup %1647  ;;  %v441_v10 = vmax.f32 %v412_v8, 0.0 }
 0x11e   : > { %v468_v11 = vmul.f32 %v1648_v9, %v440_v6 }
 0x11f   : > { %1649 = vrsqrt.f32 %v441_v10  ;;  %vm486_vm3 = vcmp.eq.f32.partialorder %v441_v10, inf  ;;  %v489_v39 = vand.u32 2147483648, %v441_v10  ;;  %vm488_vm4 = vcmp.eq.f32.partialorder %v441_v10, 0.0 }
 0x120   : > { %v469_v12 = vmul.f32 %v1648_v9, %v468_v11 }
 0x122   : > { %v470_v13 = vmul.f32 0.5, %v469_v12 }
 0x124   : > { %v414_v15 = vpop.xlane.xlu1 %413  ;;  %v471_v16 = vsub.f32 1.5, %v470_v13 }
 0x125   : > { %v1650_v17 = vpop.eup %1649  ;;  %v442_v18 = vmax.f32 %v414_v15, 0.0 }
 0x126   : > { %v472_v19 = vmul.f32 %v1648_v9, %v471_v16  ;;  %v480_v20 = vmul.f32 %v1650_v17, %v441_v10 }
 0x127   : > { %1651 = vrsqrt.f32 %v442_v18  ;;  %vm498_vm5 = vcmp.eq.f32.partialorder %v442_v18, inf  ;;  %v501_v54 = vand.u32 2147483648, %v442_v18  ;;  %vm500_vm6 = vcmp.eq.f32.partialorder %v442_v18, 0.0 }
 0x128   : > { %v473_v21 = vmul.f32 %v472_v19, %v440_v6  ;;  %v481_v23 = vmul.f32 %v1650_v17, %v480_v20 }
 0x12a   : > { %v475_v25 = vsel %vm474_vm1, %v440_v6, %v473_v21  ;;  %v482_v26 = vmul.f32 0.5, %v481_v23  ;;  %v700_v6 = vpop.f32.mrf.mxu1 }
 0x12b   : > { %v478_v27 = vsel %vm476_vm2, %v477_v24, %v475_v25 }
 0x12c   : > { %v416_v28 = vpop.xlane.xlu1 %415  ;;  %v650_v29 = vmul.f32 %v2079_v22, %v478_v27  ;;  %v483_v30 = vsub.f32 1.5, %v482_v26 }
 0x12d   : > { %v1652_v31 = vpop.eup %1651  ;;  %v443_v32 = vmax.f32 %v416_v28, 0.0 }
 0x12e   : > { %v2082_v34 = vadd.f32 %v685_v4, %v650_v29  ;;  %v484_v35 = vmul.f32 %v1650_v17, %v483_v30  ;;  %v492_v36 = vmul.f32 %v1652_v31, %v442_v18 }
 0x12f   : > { %1653 = vrsqrt.f32 %v443_v32  ;;  %vm510_vm7 = vcmp.eq.f32.partialorder %v443_v32, inf  ;;  %v513_v5 = vand.u32 2147483648, %v443_v32  ;;  %vm512_vm8 = vcmp.eq.f32.partialorder %v443_v32, 0.0 }
 0x130   : > { %749 = vmatmul.f32.vlgmr.msra.gmra.mxu2 %v2082_v34  ;;  %v485_v37 = vmul.f32 %v484_v35, %v441_v10  ;;  %v493_v38 = vmul.f32 %v1652_v31, %v492_v36 }
 0x132   : > { %v487_v40 = vsel %vm486_vm3, %v441_v10, %v485_v37  ;;  %v494_v41 = vmul.f32 0.5, %v493_v38  ;;  %v703_v25 = vpop.f32.mrf.mxu1 }
 0x133   : > { %v490_v42 = vsel %vm488_vm4, %v489_v39, %v487_v40 }
 0x134   : > { %v418_v43 = vpop.xlane.xlu2 %417  ;;  %v651_v44 = vmul.f32 %v2079_v22, %v490_v42  ;;  %v495_v45 = vsub.f32 1.5, %v494_v41 }
 0x135   : > { %v1654_v46 = vpop.eup %1653  ;;  %v444_v47 = vmax.f32 %v418_v43, 0.0 }
 0x136   : > { %v2086_v48 = vadd.f32 %v688_v7, %v651_v44  ;;  %v496_v49 = vmul.f32 %v1652_v31, %v495_v45  ;;  %v504_v50 = vmul.f32 %v1654_v46, %v443_v32 }
 0x137   : > { %1655 = vrsqrt.f32 %v444_v47  ;;  %vm522_vm9 = vcmp.eq.f32.partialorder %v444_v47, inf  ;;  %v525_v20 = vand.u32 2147483648, %v444_v47  ;;  %vm524_vm10 = vcmp.eq.f32.partialorder %v444_v47, 0.0 }
 0x138   : > { %752 = vmatmul.f32.gmra.mxu2 %v2086_v48  ;;  %v497_v52 = vmul.f32 %v496_v49, %v442_v18  ;;  %v505_v53 = vmul.f32 %v1654_v46, %v504_v50 }
 0x13a   : > { %v499_v55 = vsel %vm498_vm5, %v442_v18, %v497_v52  ;;  %v506_v56 = vmul.f32 0.5, %v505_v53 }
 0x13b   : > { %v502_v57 = vsel %vm500_vm6, %v501_v54, %v499_v55 }
 0x13c   : > { %v420_v58 = vpop.xlane.xlu2 %419  ;;  %v652_v59 = vmul.f32 %v2079_v22, %v502_v57  ;;  %v507_v60 = vsub.f32 1.5, %v506_v56 }
 0x13d   : > { %v1656_v62 = vpop.eup %1655  ;;  %v445_v63 = vmax.f32 %v420_v58, 0.0 }
 0x13e   : > { %v2090_v0 = vadd.f32 %v691_v14, %v652_v59  ;;  %v508_v1 = vmul.f32 %v1654_v46, %v507_v60  ;;  %v516_v2 = vmul.f32 %v1656_v62, %v444_v47  ;;  %v706_v46 = vpop.f32.mrf.mxu1 }
 0x13f   : > { %1657 = vrsqrt.f32 %v445_v63  ;;  %vm534_vm11 = vcmp.eq.f32.partialorder %v445_v63, inf  ;;  %v537_v37 = vand.u32 2147483648, %v445_v63  ;;  %vm536_vm12 = vcmp.eq.f32.partialorder %v445_v63, 0.0 }
 0x140   : > { %755 = vmatmul.f32.gmra.mxu2 %v2090_v0  ;;  %v509_v3 = vmul.f32 %v508_v1, %v443_v32  ;;  %v517_v4 = vmul.f32 %v1656_v62, %v516_v2 }
 0x142   : > { %v511_v7 = vsel %vm510_vm7, %v443_v32, %v509_v3  ;;  %v518_v8 = vmul.f32 0.5, %v517_v4 }
 0x143   : > { %v514_v9 = vsel %vm512_vm8, %v513_v5, %v511_v7 }
 0x144   : > { %v422_v10 = vpop.xlane.xlu0 %421  ;;  %v653_v11 = vmul.f32 %v2079_v22, %v514_v9  ;;  %v519_v12 = vsub.f32 1.5, %v518_v8 }
 0x145   : > { %v1658_v13 = vpop.eup %1657  ;;  %v446_v14 = vmax.f32 %v422_v10, 0.0 }
 0x146   : > { %v2094_v15 = vadd.f32 %v694_v33, %v653_v11  ;;  %v520_v16 = vmul.f32 %v1656_v62, %v519_v12  ;;  %v528_v17 = vmul.f32 %v1658_v13, %v445_v63  ;;  %v709_v3 = vpop.f32.mrf.mxu1 }
 0x147   : > { %1659 = vrsqrt.f32 %v446_v14  ;;  %vm546_vm13 = vcmp.eq.f32.partialorder %v446_v14, inf  ;;  %v549_v53 = vand.u32 2147483648, %v446_v14  ;;  %vm548_vm14 = vcmp.eq.f32.partialorder %v446_v14, 0.0 }
 0x148   : > { %758 = vmatmul.f32.gmra.mxu2 %v2094_v15  ;;  %v521_v18 = vmul.f32 %v520_v16, %v444_v47  ;;  %v529_v19 = vmul.f32 %v1658_v13, %v528_v17 }
 0x14a   : > { %v523_v21 = vsel %vm522_vm9, %v444_v47, %v521_v18  ;;  %v530_v23 = vmul.f32 0.5, %v529_v19 }
 0x14b   : > { %v526_v24 = vsel %vm524_vm10, %v525_v20, %v523_v21 }
 0x14c   : > { %v424_v26 = vpop.xlane.xlu1 %423  ;;  %v654_v27 = vmul.f32 %v2079_v22, %v526_v24  ;;  %v531_v28 = vsub.f32 1.5, %v530_v23 }
 0x14d   : > { %v1660_v29 = vpop.eup %1659  ;;  %v447_v30 = vmax.f32 %v424_v26, 0.0 }
 0x14e   : > { %v2098_v31 = vadd.f32 %v697_v51, %v654_v27  ;;  %v532_v32 = vmul.f32 %v1658_v13, %v531_v28  ;;  %v540_v33 = vmul.f32 %v1660_v29, %v446_v14  ;;  %v712_v23 = vpop.f32.mrf.mxu1 }
 0x14f   : > { %1661 = vrsqrt.f32 %v447_v30  ;;  %vm558_vm15 = vcmp.eq.f32.partialorder %v447_v30, inf  ;;  %vm560_vm0 = vcmp.eq.f32.partialorder %v447_v30, 0.0 }
 0x150   : > { %761 = vmatmul.f32.gmra.mxu2 %v2098_v31  ;;  %v533_v35 = vmul.f32 %v532_v32, %v445_v63  ;;  %v541_v36 = vmul.f32 %v1660_v29, %v540_v33 }
 0x152   : > { %v535_v38 = vsel %vm534_vm11, %v445_v63, %v533_v35  ;;  %v542_v39 = vmul.f32 0.5, %v541_v36 }
 0x153   : > { %v538_v40 = vsel %vm536_vm12, %v537_v37, %v535_v38 }
 0x154   : > { %v426_v41 = vpop.xlane.xlu2 %425  ;;  %v655_v42 = vmul.f32 %v2079_v22, %v538_v40  ;;  %v543_v43 = vsub.f32 1.5, %v542_v39 }
 0x155   : > { %v1662_v44 = vpop.eup %1661  ;;  %v448_v45 = vmax.f32 %v426_v41, 0.0 }
 0x156   : > { %v2102_v47 = vadd.f32 %v700_v6, %v655_v42  ;;  %v544_v49 = vmul.f32 %v1660_v29, %v543_v43  ;;  %v552_v50 = vmul.f32 %v1662_v44, %v447_v30  ;;  %v561_v6 = vand.u32 2147483648, %v447_v30  ;;  %v715_v43 = vpop.f32.mrf.mxu1 }
 0x157   : > { %1663 = vrsqrt.f32 %v448_v45  ;;  %vm570_vm1 = vcmp.eq.f32.partialorder %v448_v45, inf  ;;  %v573_v21 = vand.u32 2147483648, %v448_v45  ;;  %vm572_vm2 = vcmp.eq.f32.partialorder %v448_v45, 0.0 }
 0x158   : > { %764 = vmatmul.f32.gmra.mxu2 %v2102_v47  ;;  %v545_v51 = vmul.f32 %v544_v49, %v446_v14  ;;  %v553_v52 = vmul.f32 %v1662_v44, %v552_v50 }
 0x15a   : > { %v547_v54 = vsel %vm546_vm13, %v446_v14, %v545_v51  ;;  %v554_v55 = vmul.f32 0.5, %v553_v52 }
 0x15b   : > { %v550_v56 = vsel %vm548_vm14, %v549_v53, %v547_v54 }
 0x15c   : > { %v428_v57 = vpop.xlane.xlu0 %427  ;;  %v656_v58 = vmul.f32 %v2079_v22, %v550_v56  ;;  %v555_v59 = vsub.f32 1.5, %v554_v55 }
 0x15d   : > { %v1664_v60 = vpop.eup %1663  ;;  %v449_v62 = vmax.f32 %v428_v57, 0.0 }
 0x15e   : > { %v2106_v63 = vadd.f32 %v703_v25, %v656_v58  ;;  %v556_v1 = vmul.f32 %v1662_v44, %v555_v59  ;;  %v564_v2 = vmul.f32 %v1664_v60, %v448_v45 }
 0x15f   : > { %1665 = vrsqrt.f32 %v449_v62  ;;  %vm582_vm3 = vcmp.eq.f32.partialorder %v449_v62, inf  ;;  %v585_v39 = vand.u32 2147483648, %v449_v62  ;;  %vm584_vm4 = vcmp.eq.f32.partialorder %v449_v62, 0.0 }
 0x160   : > { %767 = vmatmul.f32.gmra.mxu2 %v2106_v63  ;;  %v557_v4 = vmul.f32 %v556_v1, %v447_v30  ;;  %v565_v5 = vmul.f32 %v1664_v60, %v564_v2 }
 0x162   : > { %v559_v7 = vsel %vm558_vm15, %v447_v30, %v557_v4  ;;  %v566_v8 = vmul.f32 0.5, %v565_v5 }
 0x163   : > { %v562_v9 = vsel %vm560_vm0, %v561_v6, %v559_v7  ;;  %v718_v6 = vpop.f32.mrf.mxu1 }
 0x164   : > { %v430_v10 = vpop.xlane.xlu1 %429  ;;  %v657_v11 = vmul.f32 %v2079_v22, %v562_v9  ;;  %v567_v12 = vsub.f32 1.5, %v566_v8 }
 0x165   : > { %v1666_v13 = vpop.eup %1665  ;;  %v450_v14 = vmax.f32 %v430_v10, 0.0 }
 0x166   : > { %v2110_v16 = vadd.f32 %v706_v46, %v657_v11  ;;  %v568_v17 = vmul.f32 %v1664_v60, %v567_v12  ;;  %v576_v18 = vmul.f32 %v1666_v13, %v449_v62 }
 0x167   : > { %1667 = vrsqrt.f32 %v450_v14  ;;  %vm594_vm5 = vcmp.eq.f32.partialorder %v450_v14, inf  ;;  %v597_v56 = vand.u32 2147483648, %v450_v14  ;;  %vm596_vm6 = vcmp.eq.f32.partialorder %v450_v14, 0.0 }
 0x168   : > { %770 = vmatmul.f32.gmra.mxu2 %v2110_v16  ;;  %v569_v19 = vmul.f32 %v568_v17, %v448_v45  ;;  %v577_v20 = vmul.f32 %v1666_v13, %v576_v18 }
 0x16a   : > { %v571_v24 = vsel %vm570_vm1, %v448_v45, %v569_v19  ;;  %v578_v25 = vmul.f32 0.5, %v577_v20 }
 0x16b   : > { %v574_v26 = vsel %vm572_vm2, %v573_v21, %v571_v24 }
 0x16c   : > { %v432_v27 = vpop.xlane.xlu2 %431  ;;  %v658_v28 = vmul.f32 %v2079_v22, %v574_v26  ;;  %v579_v29 = vsub.f32 1.5, %v578_v25 }
 0x16d   : > { %v1668_v30 = vpop.eup %1667  ;;  %v451_v32 = vmax.f32 %v432_v27, 0.0 }
 0x16e   : > { %v2114_v33 = vadd.f32 %v709_v3, %v658_v28  ;;  %v580_v35 = vmul.f32 %v1666_v13, %v579_v29  ;;  %v588_v36 = vmul.f32 %v1668_v30, %v450_v14  ;;  %v721_v28 = vpop.f32.mrf.mxu1 }
 0x16f   : > { %1669 = vrsqrt.f32 %v451_v32  ;;  %vm606_vm7 = vcmp.eq.f32.partialorder %v451_v32, inf  ;;  %v609_v12 = vand.u32 2147483648, %v451_v32  ;;  %vm608_vm8 = vcmp.eq.f32.partialorder %v451_v32, 0.0 }
 0x170   : > { %773 = vmatmul.f32.gmra.mxu2 %v2114_v33  ;;  %v581_v37 = vmul.f32 %v580_v35, %v449_v62  ;;  %v589_v38 = vmul.f32 %v1668_v30, %v588_v36 }
 0x172   : > { %v583_v40 = vsel %vm582_vm3, %v449_v62, %v581_v37  ;;  %v590_v41 = vmul.f32 0.5, %v589_v38 }
 0x173   : > { %v586_v42 = vsel %vm584_vm4, %v585_v39, %v583_v40 }
 0x174   : > { %v434_v44 = vpop.xlane.xlu0 %433  ;;  %v659_v45 = vmul.f32 %v2079_v22, %v586_v42  ;;  %v591_v46 = vsub.f32 1.5, %v590_v41 }
 0x175   : > { %v1670_v49 = vpop.eup %1669  ;;  %v452_v50 = vmax.f32 %v434_v44, 0.0 }
 0x176   : > { %v2118_v51 = vadd.f32 %v712_v23, %v659_v45  ;;  %v592_v52 = vmul.f32 %v1668_v30, %v591_v46  ;;  %v600_v53 = vmul.f32 %v1670_v49, %v451_v32 }
 0x177   : > { %1671 = vrsqrt.f32 %v452_v50  ;;  %vm618_vm9 = vcmp.eq.f32.partialorder %v452_v50, inf  ;;  %v621_v35 = vand.u32 2147483648, %v452_v50  ;;  %vm620_vm10 = vcmp.eq.f32.partialorder %v452_v50, 0.0 }
 0x178   : > { %776 = vmatmul.f32.gmra.mxu2 %v2118_v51  ;;  %v593_v54 = vmul.f32 %v592_v52, %v450_v14  ;;  %v601_v55 = vmul.f32 %v1670_v49, %v600_v53 }
 0x17a   : > { %v595_v57 = vsel %vm594_vm5, %v450_v14, %v593_v54  ;;  %v602_v58 = vmul.f32 0.5, %v601_v55  ;;  %v724_v55 = vpop.f32.mrf.mxu1 }
 0x17b   : > { %v598_v59 = vsel %vm596_vm6, %v597_v56, %v595_v57 }
 0x17c   : > { %v436_v60 = vpop.xlane.xlu1 %435  ;;  %v408_v62 = vpop.xlane.xlu0 %407  ;;  %v660_v1 = vmul.f32 %v2079_v22, %v598_v59  ;;  %v603_v2 = vsub.f32 1.5, %v602_v58 }
 0x17d   : > { %v1672_v3 = vpop.eup %1671  ;;  %v453_v4 = vmax.f32 %v436_v60, 0.0  ;;  %v2122_v5 = vmax.f32 %v408_v62, 0.0 }
 0x17e   : > { %v2124_v7 = vadd.f32 %v715_v43, %v660_v1  ;;  %v604_v8 = vmul.f32 %v1670_v49, %v603_v2  ;;  %v612_v9 = vmul.f32 %v1672_v3, %v452_v50 }
 0x17f   : > { %1673 = vrsqrt.f32 %v453_v4  ;;  %vm630_vm11 = vcmp.eq.f32.partialorder %v453_v4, inf  ;;  %v633_v52 = vand.u32 2147483648, %v453_v4  ;;  %vm632_vm12 = vcmp.eq.f32.partialorder %v453_v4, 0.0 }
 0x180   : > { %1675 = vrsqrt.f32 %v2122_v5  ;;  %779 = vmatmul.f32.gmra.mxu2 %v2124_v7  ;;  %v605_v10 = vmul.f32 %v604_v8, %v451_v32  ;;  %v613_v11 = vmul.f32 %v1672_v3, %v612_v9  ;;  %vm462_vm13 = vcmp.eq.f32.partialorder %v2122_v5, inf }
 0x181   : > { %v465_v58 = vand.u32 2147483648, %v2122_v5  ;;  %vm464_vm14 = vcmp.eq.f32.partialorder %v2122_v5, 0.0  ;;  %v1792_v8 = vmov 0  }
 0x182   : > { %v607_v13 = vsel %vm606_vm7, %v451_v32, %v605_v10  ;;  %v614_v14 = vmul.f32 0.5, %v613_v11  ;;  %1632 = vset.pattern.permute.xlu1 %v1792_v8  ;;  %1633 = vset.pattern.permute.xlu2 %v1792_v8 }
 0x183   : > { %v610_v17 = vsel %vm608_vm8, %v609_v12, %v607_v13  ;;  %1634 = vset.pattern.permute.xlu0 %v1792_v8 }
 0x184   : > { %v438_v18 = vpop.xlane.xlu2 %437  ;;  %v661_v19 = vmul.f32 %v2079_v22, %v610_v17  ;;  %v615_v20 = vsub.f32 1.5, %v614_v14  ;;  %v727_v14 = vpop.f32.mrf.mxu1 }
 0x185   : > { %v1674_v21 = vpop.eup %1673  ;;  %v454_v23 = vmax.f32 %v438_v18, 0.0 }
 0x186   : > { %v1676_v24 = vpop.eup %1675  ;;  %v2129_v25 = vadd.f32 %v718_v6, %v661_v19  ;;  %v616_v26 = vmul.f32 %v1672_v3, %v615_v20  ;;  %v624_v27 = vmul.f32 %v1674_v21, %v453_v4 }
 0x187   : > { %1677 = vrsqrt.f32 %v454_v23  ;;  %v456_v29 = vmul.f32 %v1676_v24, %v2122_v5  ;;  %vm642_vm15 = vcmp.eq.f32.partialorder %v454_v23, inf  ;;  %vm644_vm0 = vcmp.eq.f32.partialorder %v454_v23, 0.0 }
 0x188   : > { %782 = vmatmul.f32.gmra.mxu2 %v2129_v25  ;;  %v617_v30 = vmul.f32 %v616_v26, %v452_v50  ;;  %v625_v32 = vmul.f32 %v1674_v21, %v624_v27 }
 0x189   : > { %v457_v36 = vmul.f32 %v1676_v24, %v456_v29 }
 0x18a   : > { %v619_v37 = vsel %vm618_vm9, %v452_v50, %v617_v30  ;;  %v626_v38 = vmul.f32 0.5, %v625_v32 }
 0x18b   : > { %v622_v39 = vsel %vm620_vm10, %v621_v35, %v619_v37  ;;  %v458_v40 = vmul.f32 0.5, %v457_v36 }
 0x18c   : > { %v662_v41 = vmul.f32 %v2079_v22, %v622_v39  ;;  %v627_v42 = vsub.f32 1.5, %v626_v38 }
 0x18d   : > { %v1678_v43 = vpop.eup %1677  ;;  %v459_v44 = vsub.f32 1.5, %v458_v40 }
 0x18e   : > { %v2134_v45 = vadd.f32 %v721_v28, %v662_v41  ;;  %v628_v46 = vmul.f32 %v1674_v21, %v627_v42  ;;  %v636_v49 = vmul.f32 %v1678_v43, %v454_v23 }
 0x18f   : > { %v460_v53 = vmul.f32 %v1676_v24, %v459_v44 }
 0x190   : > { %785 = vmatmul.f32.gmra.mxu2 %v2134_v45  ;;  %v629_v54 = vmul.f32 %v628_v46, %v453_v4  ;;  %v637_v50 = vmul.f32 %v1678_v43, %v636_v49 }
 0x191   : > { %v461_v56 = vmul.f32 %v460_v53, %v2122_v5 }
 0x192   : > { %v631_v57 = vsel %vm630_vm11, %v453_v4, %v629_v54  ;;  %v638_v59 = vmul.f32 0.5, %v637_v50 }
 0x193   : > { %v634_v60 = vsel %vm632_vm12, %v633_v52, %v631_v57  ;;  %v463_v62 = vsel %vm462_vm13, %v2122_v5, %v461_v56  ;;  %v645_v5 = vand.u32 2147483648, %v454_v23 }
 0x194   : > { %v663_v1 = vmul.f32 %v2079_v22, %v634_v60  ;;  %v466_v2 = vsel %vm464_vm14, %v465_v58, %v463_v62  ;;  %v639_v3 = vsub.f32 1.5, %v638_v59 }
 0x195   : > { %v649_v6 = vmul.f32 %v2079_v22, %v466_v2 }
 0x196   : > { %v2146_v4 = vadd.f32 %v724_v55, %v663_v1  ;;  %v640_v9 = vmul.f32 %v1678_v43, %v639_v3 }
 0x197   : > { %v2150_v10 = vadd.f32 %v2042_v61, %v649_v6 }
 0x198   : > { %788 = vmatmul.f32.gmra.mxu2 %v2146_v4  ;;  %v641_v11 = vmul.f32 %v640_v9, %v454_v23 }
 0x199   : > { %746 = vmatmul.f32.vlgmr.msrb.gmra.mxu0 %v2150_v10 }
 0x19a   : > { %v643_v12 = vsel %vm642_vm15, %v454_v23, %v641_v11 }
 0x19b   : > { %v646_v13 = vsel %vm644_vm0, %v645_v5, %v643_v12 }
 0x19c   : > { %v664_v17 = vmul.f32 %v2079_v22, %v646_v13 }
 0x19e   : > { %v2155_v18 = vadd.f32 %v727_v14, %v664_v17 }
 0x1a0   : > { %791 = vmatmul.f32.gmra.mxu2 %v2155_v18 }
 0x1b3   : > { %v750_v19 = vpop.f32.mrf.mxu2 }
 0x1b4   : > { %v796_v61 = vmul.f32 0.0078125, %v750_v19 }
 0x1b6   : > { %818 = vperm.xlu1 %1632, %v796_v61  }
 0x1bb   : > { %v753_v20 = vpop.f32.mrf.mxu2 }
 0x1bc   : > { %v797_v21 = vmul.f32 0.0078125, %v753_v20 }
 0x1be   : > { %823 = vperm.xlu2 %1633, %v797_v21  }
 0x1c3   : > { %v756_v24 = vpop.f32.mrf.mxu2 }
 0x1c4   : > { %v798_v26 = vmul.f32 0.0078125, %v756_v24 }
 0x1c6   : > { %828 = vperm.xlu0 %1634, %v798_v26  }
 0x1cb   : > { %v759_v27 = vpop.f32.mrf.mxu2 }
 0x1cc   : > { %v799_v28 = vmul.f32 0.0078125, %v759_v27 }
 0x1ce   : > { %833 = vperm.xlu2 %1633, %v799_v28  }
 0x1d3   : > { %v762_v23 = vpop.f32.mrf.mxu2 }
 0x1d4   : > { %v800_v29 = vmul.f32 0.0078125, %v762_v23 }
 0x1d6   : > { %838 = vperm.xlu1 %1632, %v800_v29  }
 0x1db   : > { %v765_v22 = vpop.f32.mrf.mxu2 }
 0x1dc   : > { %v801_v30 = vmul.f32 0.0078125, %v765_v22  ;;  %v1712_v22 = vld [vmem:[%s1883_s10 + $0x8] sm:$0xff] }
 0x1de   : > { %843 = vperm.xlu2 %1633, %v801_v30  }
 0x1e3   : > { %v768_v32 = vpop.f32.mrf.mxu2 }
 0x1e4   : > { %v802_v35 = vmul.f32 0.0078125, %v768_v32 }
 0x1e6   : > { %848 = vperm.xlu1 %1632, %v802_v35  }
 0x1eb   : > { %v771_v36 = vpop.f32.mrf.mxu2 }
 0x1ec   : > { %v803_v37 = vmul.f32 0.0078125, %v771_v36  ;;  %v1714_v36 = vld [vmem:[%s1883_s10 + $0x18] sm:$0xff] }
 0x1ee   : > { %853 = vperm.xlu2 %1633, %v803_v37   ;;  %v1715_v37 = vld [vmem:[%s1883_s10 + $0x30] sm:$0xff] }
 0x1f3   : > { %v774_v38 = vpop.f32.mrf.mxu2 }
 0x1f4   : > { %v804_v39 = vmul.f32 0.0078125, %v774_v38  ;;  %v1716_v38 = vld [vmem:[%s1883_s10 + $0x20] sm:$0xff] }
 0x1f6   : > { %858 = vperm.xlu1 %1632, %v804_v39  }
 0x1fb   : > { %v777_v40 = vpop.f32.mrf.mxu2 }
 0x1fc   : > { %v805_v41 = vmul.f32 0.0078125, %v777_v40 }
 0x1fe   : > { %863 = vperm.xlu0 %1634, %v805_v41   ;;  %v1717_v41 = vld [vmem:[%s1883_s10 + $0x28] sm:$0xff] }
 0x203   : > { %v780_v42 = vpop.f32.mrf.mxu2 }
 0x204   : > { %v806_v43 = vmul.f32 0.0078125, %v780_v42  ;;  %v1718_v42 = vld [vmem:[%s1883_s10 + $0x48] sm:$0xff] }
 0x206   : > { %868 = vperm.xlu2 %1633, %v806_v43  }
 0x20b   : > { %v783_v44 = vpop.f32.mrf.mxu2 }
 0x20c   : > { %v807_v46 = vmul.f32 0.0078125, %v783_v44  ;;  %v1719_v44 = vld [vmem:[%s1883_s10 + $0x38] sm:$0xff] }
 0x20e   : > { %873 = vperm.xlu1 %1632, %v807_v46  }
 0x213   : > { %v786_v49 = vpop.f32.mrf.mxu2 }
 0x214   : > { %v808_v52 = vmul.f32 0.0078125, %v786_v49 }
 0x216   : > { %878 = vperm.xlu0 %1634, %v808_v52   ;;  %v747_v53 = vpop.f32.mrf.mxu0 }
 0x217   : > { %v795_v50 = vmul.f32 0.0078125, %v747_v53 }
 0x218   : > { %v824_v62 = vpop.permute.xlu2 %823 }
 0x219   : > { %v2164_v1 = vsub.f32 %v2086_v48, %v824_v62 }
 0x21b   : > { %v789_v54 = vpop.f32.mrf.mxu2  ;;  %v909_v2 = vmul.f32 %v2164_v1, %v2164_v1 }
 0x21c   : > { %v809_v55 = vmul.f32 0.0078125, %v789_v54  ;;  %v1720_v54 = vld [vmem:[%s1883_s10 + $0x40] sm:$0xff] }
 0x21e   : > { %883 = vperm.xlu2 %1633, %v809_v55   ;;  %813 = vperm.xlu0 %1634, %v795_v50   ;;  %v1721_v50 = vld [vmem:[%s1883_s10 + $0x60] sm:$0xff]  ;;  %v1722_v55 = vld [vmem:[%s1883_s10 + $0x50] sm:$0xff] }
 0x223   : > { %v792_v56 = vpop.f32.mrf.mxu2 }
 0x224   : > { %v810_v57 = vmul.f32 0.0078125, %v792_v56 }
 0x226   : > { %888 = vperm.xlu1 %1632, %v810_v57   ;;  %v1723_v57 = vld [vmem:[%s1883_s10 + $0x58] sm:$0xff] }
 0x228   : > { %v819_v58 = vpop.permute.xlu1 %818  ;;  %v834_v9 = vpop.permute.xlu2 %833 }
 0x229   : > { %v2159_v59 = vsub.f32 %v2082_v34, %v819_v58  ;;  %v2174_v5 = vsub.f32 %v2094_v15, %v834_v9 }
 0x22b   : > { %v908_v60 = vmul.f32 %v2159_v59, %v2159_v59  ;;  %v911_v48 = vmul.f32 %v2174_v5, %v2174_v5 }
 0x22d   : > { %942 = vmatmul.f32.vlgmr.msra.gmra.mxu3 %v908_v60 }
 0x235   : > { %945 = vmatmul.f32.gmra.mxu3 %v909_v2 }
 0x238   : > { %v829_v3 = vpop.permute.xlu0 %828  ;;  %v844_v13 = vpop.permute.xlu2 %843 }
 0x239   : > { %v2169_v6 = vsub.f32 %v2090_v0, %v829_v3  ;;  %v2184_v14 = vsub.f32 %v2102_v47, %v844_v13 }
 0x23b   : > { %v910_v34 = vmul.f32 %v2169_v6, %v2169_v6  ;;  %v913_v15 = vmul.f32 %v2184_v14, %v2184_v14 }
 0x23d   : > { %948 = vmatmul.f32.gmra.mxu3 %v910_v34 }
 0x245   : > { %951 = vmatmul.f32.gmra.mxu3 %v911_v48 }
 0x248   : > { %v839_v11 = vpop.permute.xlu1 %838  ;;  %v854_v61 = vpop.permute.xlu2 %853 }
 0x249   : > { %v2179_v12 = vsub.f32 %v2098_v31, %v839_v11  ;;  %v2194_v20 = vsub.f32 %v2110_v16, %v854_v61 }
 0x24b   : > { %v912_v0 = vmul.f32 %v2179_v12, %v2179_v12  ;;  %v915_v47 = vmul.f32 %v2194_v20, %v2194_v20 }
 0x24d   : > { %954 = vmatmul.f32.gmra.mxu3 %v912_v0 }
 0x255   : > { %957 = vmatmul.f32.gmra.mxu3 %v913_v15 }
 0x258   : > { %v849_v17 = vpop.permute.xlu1 %848 }
 0x259   : > { %v2189_v19 = vsub.f32 %v2106_v63, %v849_v17 }
 0x25b   : > { %v914_v31 = vmul.f32 %v2189_v19, %v2189_v19 }
 0x25d   : > { %960 = vmatmul.f32.gmra.mxu3 %v914_v31 }
 0x260   : > { %v869_v28 = vpop.permute.xlu2 %868 }
 0x261   : > { %v2209_v23 = vsub.f32 %v2124_v7, %v869_v28  ;;  %v1713_v7 = vld [vmem:[%s1883_s10 + $0x10] sm:$0xff] }
 0x263   : > { %v918_v29 = vmul.f32 %v2209_v23, %v2209_v23 }
 0x265   : > { %963 = vmatmul.f32.gmra.mxu3 %v915_v47 }
 0x268   : > { %v859_v21 = vpop.permute.xlu1 %858 }
 0x269   : > { %v2199_v24 = vsub.f32 %v2114_v33, %v859_v21  ;;  %v1793_v33 = vmov 6  }
 0x26a   : > { %1635 = vset.pattern.permute.xlu1 %v1793_v33  ;;  %1636 = vset.pattern.permute.xlu0 %v1793_v33 }
 0x26b   : > { %v916_v63 = vmul.f32 %v2199_v24, %v2199_v24  ;;  %1315 = vperm.xlu0 %1636, %v1712_v22   ;;  %1637 = vset.pattern.permute.xlu2 %v1793_v33 }
 0x26c   : > { %1319 = vperm.xlu2 %1637, %v1713_v7  }
 0x26d   : > { %966 = vmatmul.f32.gmra.mxu3 %v916_v63 }
 0x270   : > { %v864_v26 = vpop.permute.xlu0 %863 }
 0x271   : > { %v2204_v27 = vsub.f32 %v2118_v51, %v864_v26  ;;  %v1711_v51 = vld [vmem:[%s1883_s10] sm:$0xff] }
 0x272   : > { %1311 = vperm.xlu1 %1635, %v1711_v51  }
 0x273   : > { %v917_v16 = vmul.f32 %v2204_v27, %v2204_v27  ;;  %1335 = vperm.xlu0 %1636, %v1715_v37  }
 0x274   : > { %1327 = vperm.xlu2 %1637, %v1716_v38  }
 0x275   : > { %969 = vmatmul.f32.gmra.mxu3 %v917_v16 }
 0x278   : > { %v884_v43 = vpop.permute.xlu2 %883 }
 0x279   : > { %v2236_v46 = vsub.f32 %v2146_v4, %v884_v43 }
 0x27a   : > { %1323 = vperm.xlu1 %1635, %v1714_v36  }
 0x27b   : > { %1347 = vperm.xlu0 %1636, %v1718_v42   ;;  %v921_v53 = vmul.f32 %v2236_v46, %v2236_v46 }
 0x27c   : > { %1339 = vperm.xlu2 %1637, %v1719_v44  }
 0x27d   : > { %972 = vmatmul.f32.gmra.mxu3 %v918_v29 }
 0x280   : > { %v874_v30 = vpop.permute.xlu1 %873 }
 0x281   : > { %v2220_v32 = vsub.f32 %v2129_v25, %v874_v30 }
 0x282   : > { %1331 = vperm.xlu1 %1635, %v1717_v41  }
 0x283   : > { %v919_v35 = vmul.f32 %v2220_v32, %v2220_v32  ;;  %1359 = vperm.xlu0 %1636, %v1721_v50  }
 0x284   : > { %1351 = vperm.xlu2 %1637, %v1722_v55  }
 0x285   : > { %975 = vmatmul.f32.gmra.mxu3 %v919_v35 }
 0x288   : > { %v879_v39 = vpop.permute.xlu0 %878 }
 0x289   : > { %v2228_v40 = vsub.f32 %v2134_v45, %v879_v39 }
 0x28a   : > { %1343 = vperm.xlu1 %1635, %v1720_v54  }
 0x28b   : > { %v920_v25 = vmul.f32 %v2228_v40, %v2228_v40  ;;  %1640 = vset.pattern.permute.xlu0 %v1792_v8 }
 0x28c   : > { %1638 = vset.pattern.permute.xlu2 %v1792_v8 }
 0x28d   : > { %978 = vmatmul.f32.gmra.mxu3 %v920_v25 }
 0x290   : > { %v814_v49 = vpop.permute.xlu0 %813 }
 0x291   : > { %v2239_v45 = vsub.f32 %v2150_v10, %v814_v49 }
 0x292   : > { %1355 = vperm.xlu1 %1635, %v1723_v57  }
 0x293   : > { %v907_v52 = vmul.f32 %v2239_v45, %v2239_v45 }
 0x295   : > { %939 = vmatmul.f32.vlgmr.msrb.gmra.mxu1 %v907_v52  ;;  %981 = vmatmul.f32.gmra.mxu3 %v921_v53 }
 0x298   : > { %v889_v4 = vpop.permute.xlu1 %888 }
 0x299   : > { %v2249_v56 = vsub.f32 %v2155_v18, %v889_v4 }
 0x29a   : > { %1639 = vset.pattern.permute.xlu1 %v1792_v8 }
 0x29b   : > { %v922_v10 = vmul.f32 %v2249_v56, %v2249_v56 }
 0x29d   : > { %984 = vmatmul.f32.gmra.mxu3 %v922_v10 }
 0x2b0   : > { %v943_v58 = vpop.f32.mrf.mxu3 }
 0x2b1   : > { %v989_v60 = vmul.f32 0.0078125, %v943_v58 }
 0x2b3   : > { %v1005_v62 = vadd.f32 1e-05, %v989_v60 }
 0x2b5   : > { %1679 = vrsqrt.f32 %v1005_v62  ;;  %vm1036_vm2 = vweird.f32 %v1005_v62 }
 0x2b8   : > { %v946_v2 = vpop.f32.mrf.mxu3 }
 0x2b9   : > { %v990_v3 = vmul.f32 0.0078125, %v946_v2 }
 0x2bb   : > { %v1680_v18 = vpop.eup %1679  ;;  %v1006_v34 = vadd.f32 1e-05, %v990_v3 }
 0x2bc   : > { %v1031_v9 = vmul.f32 %v1680_v18, %v1005_v62  ;;  %vm1037_vm1 = vweird.f32 %v1680_v18 }
 0x2bd   : > { %1681 = vrsqrt.f32 %v1006_v34  ;;  %vm1038_vm3 = vmor %vm1036_vm2, %vm1037_vm1  ;;  %vm1046_vm5 = vweird.f32 %v1006_v34 }
 0x2be   : > { %v1032_v48 = vmul.f32 %v1680_v18, %v1031_v9 }
 0x2c0   : > { %v1033_v11 = vmul.f32 0.5, %v1032_v48  ;;  %v2257_v0 = vpop.f32.mrf.mxu3 }
 0x2c2   : > { %v1034_v13 = vsub.f32 1.5, %v1033_v11 }
 0x2c3   : > { %v1682_v15 = vpop.eup %1681 }
 0x2c4   : > { %v1041_v17 = vmul.f32 %v1682_v15, %v1006_v34  ;;  %v1035_v31 = vmul.f32 %v1680_v18, %v1034_v13  ;;  %vm1047_vm4 = vweird.f32 %v1682_v15 }
 0x2c5   : > { %vm1048_vm6 = vmor %vm1046_vm5, %vm1047_vm4 }
 0x2c6   : > { %v1042_v8 = vmul.f32 %v1682_v15, %v1041_v17  ;;  %v1039_v61 = vsel %vm1038_vm3, %v1680_v18, %v1035_v31 }
 0x2c7   : > { %1187 = vperm.xlu1 %1639, %v1039_v61  }
 0x2c8   : > { %v1043_v47 = vmul.f32 0.5, %v1042_v8  ;;  %v952_v21 = vpop.f32.mrf.mxu3 }
 0x2c9   : > { %v992_v63 = vmul.f32 0.0078125, %v952_v21 }
 0x2ca   : > { %v1044_v26 = vsub.f32 1.5, %v1043_v47 }
 0x2cb   : > { %v1008_v16 = vadd.f32 1e-05, %v992_v63 }
 0x2cc   : > { %v1045_v28 = vmul.f32 %v1682_v15, %v1044_v26 }
 0x2cd   : > { %1683 = vrsqrt.f32 %v1008_v16  ;;  %vm1066_vm8 = vweird.f32 %v1008_v16 }
 0x2ce   : > { %v1049_v29 = vsel %vm1048_vm6, %v1682_v15, %v1045_v28 }
 0x2cf   : > { %1192 = vperm.xlu0 %1640, %v1049_v29  }
 0x2d0   : > { %v955_v51 = vpop.f32.mrf.mxu3 }
 0x2d1   : > { %v993_v22 = vmul.f32 0.0078125, %v955_v51 }
 0x2d3   : > { %v1684_v7 = vpop.eup %1683  ;;  %v1009_v30 = vadd.f32 1e-05, %v993_v22 }
 0x2d4   : > { %v1061_v35 = vmul.f32 %v1684_v7, %v1008_v16  ;;  %vm1067_vm7 = vweird.f32 %v1684_v7 }
 0x2d5   : > { %1685 = vrsqrt.f32 %v1009_v30  ;;  %vm1068_vm9 = vmor %vm1066_vm8, %vm1067_vm7  ;;  %vm1076_vm11 = vweird.f32 %v1009_v30 }
 0x2d6   : > { %v1062_v36 = vmul.f32 %v1684_v7, %v1061_v35 }
 0x2d8   : > { %v1063_v37 = vmul.f32 0.5, %v1062_v36  ;;  %v2259_v38 = vpop.f32.mrf.mxu3  ;;  %v991_v36 = vmul.f32 0.0078125, %v2257_v0 }
 0x2d9   : > { %v994_v0 = vmul.f32 0.0078125, %v2259_v38 }
 0x2da   : > { %v1064_v39 = vsub.f32 1.5, %v1063_v37 }
 0x2db   : > { %v1686_v25 = vpop.eup %1685 }
 0x2dc   : > { %v1071_v41 = vmul.f32 %v1686_v25, %v1009_v30  ;;  %v1065_v42 = vmul.f32 %v1684_v7, %v1064_v39  ;;  %vm1077_vm10 = vweird.f32 %v1686_v25 }
 0x2dd   : > { %vm1078_vm12 = vmor %vm1076_vm11, %vm1077_vm10  ;;  %v2276_v38 = vpop.permute.xlu0 %1315 }
 0x2de   : > { %v1072_v43 = vmul.f32 %v1686_v25, %v1071_v41  ;;  %v1069_v44 = vsel %vm1068_vm9, %v1684_v7, %v1065_v42  ;;  %v2266_v42 = vadd.f32 1e-05, %v991_v36 }
 0x2df   : > { %1202 = vperm.xlu1 %1639, %v1069_v44  }
 0x2e0   : > { %v1073_v49 = vmul.f32 0.5, %v1072_v43  ;;  %v961_v52 = vpop.f32.mrf.mxu3 }
 0x2e1   : > { %v995_v53 = vmul.f32 0.0078125, %v961_v52 }
 0x2e2   : > { %v1074_v54 = vsub.f32 1.5, %v1073_v49 }
 0x2e3   : > { %v1011_v50 = vadd.f32 1e-05, %v995_v53 }
 0x2e4   : > { %v1075_v55 = vmul.f32 %v1686_v25, %v1074_v54  ;;  %v2263_v7 = vpop.permute.xlu1 %1311 }
 0x2e5   : > { %1687 = vrsqrt.f32 %v1011_v50  ;;  %vm1096_vm14 = vweird.f32 %v1011_v50  ;;  %v2292_v36 = vpop.permute.xlu0 %1335 }
 0x2e6   : > { %v1079_v4 = vsel %vm1078_vm12, %v1686_v25, %v1075_v55 }
 0x2e7   : > { %1207 = vperm.xlu0 %1640, %v1079_v4  }
 0x2e8   : > { %v964_v10 = vpop.f32.mrf.mxu3 }
 0x2e9   : > { %v996_v57 = vmul.f32 0.0078125, %v964_v10 }
 0x2eb   : > { %v1688_v58 = vpop.eup %1687  ;;  %v1012_v60 = vadd.f32 1e-05, %v996_v57 }
 0x2ec   : > { %v1091_v62 = vmul.f32 %v1688_v58, %v1011_v50  ;;  %vm1097_vm13 = vweird.f32 %v1688_v58  ;;  %v2269_v54 = vpop.permute.xlu1 %1323 }
 0x2ed   : > { %1689 = vrsqrt.f32 %v1012_v60  ;;  %vm1098_vm15 = vmor %vm1096_vm14, %vm1097_vm13  ;;  %vm1106_vm1 = vweird.f32 %v1012_v60 }
 0x2ee   : > { %v1092_v2 = vmul.f32 %v1688_v58, %v1091_v62 }
 0x2f0   : > { %v1093_v3 = vmul.f32 0.5, %v1092_v2  ;;  %v2261_v18 = vpop.f32.mrf.mxu3 }
 0x2f2   : > { %v1094_v34 = vsub.f32 1.5, %v1093_v3 }
 0x2f3   : > { %v1690_v9 = vpop.eup %1689 }
 0x2f4   : > { %v1101_v48 = vmul.f32 %v1690_v9, %v1012_v60  ;;  %v1095_v11 = vmul.f32 %v1688_v58, %v1094_v34  ;;  %vm1107_vm0 = vweird.f32 %v1690_v9  ;;  %v2272_v60 = vadd.f32 1e-05, %v994_v0 }
 0x2f5   : > { %vm1108_vm2 = vmor %vm1106_vm1, %vm1107_vm0 }
 0x2f6   : > { %v1102_v13 = vmul.f32 %v1690_v9, %v1101_v48  ;;  %v1099_v15 = vsel %vm1098_vm15, %v1688_v58, %v1095_v11  ;;  %v997_v11 = vmul.f32 0.0078125, %v2261_v18 }
 0x2f7   : > { %1217 = vperm.xlu1 %1639, %v1099_v15   ;;  %v2282_v15 = vpop.permute.xlu1 %1331 }
 0x2f8   : > { %v1103_v17 = vmul.f32 0.5, %v1102_v13  ;;  %v970_v31 = vpop.f32.mrf.mxu3 }
 0x2f9   : > { %v998_v8 = vmul.f32 0.0078125, %v970_v31 }
 0x2fa   : > { %v1104_v61 = vsub.f32 1.5, %v1103_v17 }
 0x2fb   : > { %v1014_v47 = vadd.f32 1e-05, %v998_v8 }
 0x2fc   : > { %v1105_v21 = vmul.f32 %v1690_v9, %v1104_v61 }
 0x2fd   : > { %1691 = vrsqrt.f32 %v1014_v47  ;;  %vm1126_vm4 = vweird.f32 %v1014_v47 }
 0x2fe   : > { %v1109_v63 = vsel %vm1108_vm2, %v1690_v9, %v1105_v21  ;;  %v2285_v21 = vadd.f32 1e-05, %v997_v11 }
 0x2ff   : > { %1222 = vperm.xlu0 %1640, %v1109_v63  }
 0x300   : > { %v973_v26 = vpop.f32.mrf.mxu3 }
 0x301   : > { %v999_v16 = vmul.f32 0.0078125, %v973_v26 }
 0x303   : > { %v1692_v28 = vpop.eup %1691  ;;  %v1015_v29 = vadd.f32 1e-05, %v999_v16 }
 0x304   : > { %v1121_v51 = vmul.f32 %v1692_v28, %v1014_v47  ;;  %vm1127_vm3 = vweird.f32 %v1692_v28 }
 0x305   : > { %1693 = vrsqrt.f32 %v1015_v29  ;;  %vm1128_vm5 = vmor %vm1126_vm4, %vm1127_vm3  ;;  %vm1136_vm7 = vweird.f32 %v1015_v29  ;;  %vm1056_vm3 = vweird.f32 %v2266_v42 }
 0x306   : > { %v1122_v22 = vmul.f32 %v1692_v28, %v1121_v51  ;;  %1695 = vrsqrt.f32 %v2266_v42 }
 0x308   : > { %v1123_v30 = vmul.f32 0.5, %v1122_v22  ;;  %v976_v35 = vpop.f32.mrf.mxu3 }
 0x30a   : > { %v1124_v37 = vsub.f32 1.5, %v1123_v30  ;;  %v1000_v30 = vmul.f32 0.0078125, %v976_v35 }
 0x30b   : > { %v1694_v39 = vpop.eup %1693 }
 0x30c   : > { %v1131_v25 = vmul.f32 %v1694_v39, %v1015_v29  ;;  %v1125_v41 = vmul.f32 %v1692_v28, %v1124_v37  ;;  %vm1137_vm6 = vweird.f32 %v1694_v39  ;;  %v2274_v2 = vpop.eup %1695 }
 0x30d   : > { %vm1138_vm8 = vmor %vm1136_vm7, %vm1137_vm6  ;;  %v1051_v9 = vmul.f32 %v2274_v2, %v2266_v42  ;;  %vm1057_vm0 = vweird.f32 %v2274_v2  ;;  %vm1086_vm6 = vweird.f32 %v2272_v60 }
 0x30e   : > { %v1132_v43 = vmul.f32 %v1694_v39, %v1131_v25  ;;  %v1129_v44 = vsel %vm1128_vm5, %v1692_v28, %v1125_v41  ;;  %v2294_v41 = vpop.permute.xlu1 %1343  ;;  %vm1058_vm4 = vmor %vm1056_vm3, %vm1057_vm0 }
 0x30f   : > { %1232 = vperm.xlu1 %1639, %v1129_v44   ;;  %v1052_v8 = vmul.f32 %v2274_v2, %v1051_v9  ;;  %v2303_v9 = vpop.permute.xlu0 %1347 }
 0x310   : > { %v1133_v49 = vmul.f32 0.5, %v1132_v43  ;;  %v979_v52 = vpop.f32.mrf.mxu3 }
 0x311   : > { %v1001_v53 = vmul.f32 0.0078125, %v979_v52  ;;  %v1053_v28 = vmul.f32 0.5, %v1052_v8  ;;  %v2296_v52 = vadd.f32 1e-05, %v1000_v30 }
 0x312   : > { %v940_v50 = vpop.f32.mrf.mxu1  ;;  %v1134_v55 = vsub.f32 1.5, %v1133_v49 }
 0x313   : > { %v1017_v4 = vadd.f32 1e-05, %v1001_v53  ;;  %v988_v10 = vmul.f32 0.0078125, %v940_v50  ;;  %v1054_v53 = vsub.f32 1.5, %v1053_v28 }
 0x314   : > { %v1135_v57 = vmul.f32 %v1694_v39, %v1134_v55 }
 0x315   : > { %1697 = vrsqrt.f32 %v1017_v4  ;;  %v1004_v58 = vadd.f32 1e-05, %v988_v10  ;;  %vm1156_vm10 = vweird.f32 %v1017_v4 }
 0x316   : > { %v1139_v62 = vsel %vm1138_vm8, %v1694_v39, %v1135_v57 }
 0x317   : > { %1699 = vrsqrt.f32 %v1004_v58  ;;  %1237 = vperm.xlu0 %1640, %v1139_v62   ;;  %vm1026_vm13 = vweird.f32 %v1004_v58 }
 0x318   : > { %v982_v3 = vpop.f32.mrf.mxu3  ;;  %1701 = vrsqrt.f32 %v2272_v60 }
 0x319   : > { %v1002_v34 = vmul.f32 0.0078125, %v982_v3 }
 0x31b   : > { %v1698_v48 = vpop.eup %1697  ;;  %v1018_v13 = vadd.f32 1e-05, %v1002_v34 }
 0x31c   : > { %v1151_v17 = vmul.f32 %v1698_v48, %v1017_v4  ;;  %vm1157_vm9 = vweird.f32 %v1698_v48 }
 0x31d   : > { %v1700_v31 = vpop.eup %1699  ;;  %1703 = vrsqrt.f32 %v1018_v13  ;;  %vm1158_vm12 = vmor %vm1156_vm10, %vm1157_vm9  ;;  %vm1166_vm1 = vweird.f32 %v1018_v13  ;;  %vm1116_vm9 = vweird.f32 %v2285_v21 }
 0x31e   : > { %v1152_v61 = vmul.f32 %v1698_v48, %v1151_v17  ;;  %v1021_v47 = vmul.f32 %v1700_v31, %v1004_v58  ;;  %v2287_v63 = vpop.eup %1701  ;;  %1705 = vrsqrt.f32 %v2285_v21  ;;  %vm1027_vm11 = vweird.f32 %v1700_v31  ;;  %v2308_v17 = vpop.permute.xlu1 %1355 }
 0x31f   : > { %v1081_v22 = vmul.f32 %v2287_v63, %v2272_v60  ;;  %vm1028_vm14 = vmor %vm1026_vm13, %vm1027_vm11  ;;  %1707 = vrsqrt.f32 %v2296_v52  ;;  %v1055_v58 = vmul.f32 %v2274_v2, %v1054_v53  ;;  %vm1087_vm5 = vweird.f32 %v2287_v63  ;;  %v2332_v60 = vld [vmem:[%s2454_s3 + $0x2] ss:$0 sm:$0xff] }
 0x320   : > { %v1153_v26 = vmul.f32 0.5, %v1152_v61  ;;  %v1022_v16 = vmul.f32 %v1700_v31, %v1021_v47  ;;  %v985_v50 = vpop.f32.mrf.mxu3  ;;  %v1724_v61 = vld [vmem:[%s1883_s10 + $0x70] sm:$0xff]  ;;  %vm1088_vm7 = vmor %vm1086_vm6, %vm1087_vm5 }
 0x321   : > { %v1082_v35 = vmul.f32 %v2287_v63, %v1081_v22  ;;  %v1003_v57 = vmul.f32 0.0078125, %v985_v50  ;;  %v1059_v8 = vsel %vm1058_vm4, %v2274_v2, %v1055_v58  ;;  %v2318_v2 = vpop.permute.xlu0 %1359 }
 0x322   : > { %v1023_v29 = vmul.f32 0.5, %v1022_v16  ;;  %v1154_v51 = vsub.f32 1.5, %v1153_v26 }
 0x323   : > { %v1704_v18 = vpop.eup %1703  ;;  %v1083_v62 = vmul.f32 0.5, %v1082_v35  ;;  %v2306_v11 = vadd.f32 1e-05, %v1003_v57 }
 0x324   : > { %v1024_v37 = vsub.f32 1.5, %v1023_v29  ;;  %v1161_v39 = vmul.f32 %v1704_v18, %v1018_v13  ;;  %v1155_v25 = vmul.f32 %v1698_v48, %v1154_v51  ;;  %v1706_v4 = vpop.eup %1705  ;;  %vm1167_vm15 = vweird.f32 %v1704_v18  ;;  %v2324_v29 = vld [vmem:[%s2454_s3 + $0x1] ss:$0 sm:$0xff] }
 0x325   : > { %v1111_v3 = vmul.f32 %v1706_v4, %v2285_v21  ;;  %vm1168_vm2 = vmor %vm1166_vm1, %vm1167_vm15  ;;  %v1084_v13 = vsub.f32 1.5, %v1083_v62  ;;  %v1708_v47 = vpop.eup %1707  ;;  %1709 = vrsqrt.f32 %v2306_v11  ;;  %vm1117_vm8 = vweird.f32 %v1706_v4  ;;  %v1320_v21 = vpop.permute.xlu2 %1319 }
 0x326   : > { %v1162_v43 = vmul.f32 %v1704_v18, %v1161_v39  ;;  %v1159_v44 = vsel %vm1158_vm12, %v1698_v48, %v1155_v25  ;;  %v1025_v49 = vmul.f32 %v1700_v31, %v1024_v37  ;;  %v1141_v26 = vmul.f32 %v1708_v47, %v2296_v52  ;;  %vm1118_vm10 = vmor %vm1116_vm9, %vm1117_vm8 }
 0x327   : > { %1247 = vperm.xlu1 %1639, %v1159_v44   ;;  %v1085_v16 = vmul.f32 %v2287_v63, %v1084_v13  ;;  %vm1147_vm11 = vweird.f32 %v1708_v47  ;;  %vm1146_vm12 = vweird.f32 %v2296_v52  ;;  %vm1176_vm15 = vweird.f32 %v2306_v11 }
 0x328   : > { %v1163_v0 = vmul.f32 0.5, %v1162_v43  ;;  %v1029_v55 = vsel %vm1028_vm14, %v1700_v31, %v1025_v49  ;;  %v1112_v31 = vmul.f32 %v1706_v4, %v1111_v3  ;;  %v1142_v28 = vmul.f32 %v1708_v47, %v1141_v26  ;;  %vm1148_vm13 = vmor %vm1146_vm12, %vm1147_vm11 }
 0x329   : > { %1182 = vperm.xlu2 %1638, %v1029_v55   ;;  %v1089_v51 = vsel %vm1088_vm7, %v2287_v63, %v1085_v16 }
 0x32a   : > { %v1164_v10 = vsub.f32 1.5, %v1163_v0  ;;  %v1113_v42 = vmul.f32 0.5, %v1112_v31  ;;  %v1143_v25 = vmul.f32 0.5, %v1142_v28 }
 0x32b   : > { %v1710_v30 = vpop.eup %1709 }
 0x32c   : > { %v1165_v34 = vmul.f32 %v1704_v18, %v1164_v10  ;;  %v1114_v22 = vsub.f32 1.5, %v1113_v42  ;;  %v1171_v43 = vmul.f32 %v1710_v30, %v2306_v11  ;;  %v1144_v50 = vsub.f32 1.5, %v1143_v25  ;;  %v1726_v42 = vld [vmem:[%s1883_s10 + $0x68] sm:$0xff] }
 0x32d   : > { %vm1177_vm14 = vweird.f32 %v1710_v30 }
 0x32e   : > { %v1169_v48 = vsel %vm1168_vm2, %v1704_v18, %v1165_v34  ;;  %v1725_v18 = vld [vmem:[%s1883_s10 + $0x78] sm:$0xff]  ;;  %v1115_v44 = vmul.f32 %v1706_v4, %v1114_v22  ;;  %v1172_v53 = vmul.f32 %v1710_v30, %v1171_v43  ;;  %v1145_v58 = vmul.f32 %v1708_v47, %v1144_v50  ;;  %vm1178_vm0 = vmor %vm1176_vm15, %vm1177_vm14  ;;  %s1555_s10 = sshll.u32 %s1847_s22, 7  ;;  %s1407_s22 = scalar_lea.sflag [#allocation3], %s241_s7 }
 0x32f   : > { %1252 = vperm.xlu0 %1640, %v1169_v48   ;;  %1642 = vset.pattern.permute.xlu1 %v1793_v33  ;;  %s1418_s15 = scalar_lea.hbm %s2456_s5, %s1555_s10 }
 0x330   : > { %1367 = vperm.xlu1 %1642, %v1724_v61   ;;  %v1119_v0 = vsel %vm1118_vm10, %v1706_v4, %v1115_v44  ;;  %v1173_v10 = vmul.f32 0.5, %v1172_v53  ;;  %v1149_v3 = vsel %vm1148_vm13, %v1708_v47, %v1145_v58  ;;  %v1328_v61 = vpop.permute.xlu2 %1327  ;;  %s1421_s17 = sshll.u32 %s1418_s15, 4  ;;  %s1422_s17 = int_to_ptr.hbm [resolvable:$true] %s1421_s17 }
 0x331   : > { %1197 = vperm.xlu2 %1638, %v1059_v8   ;;  %s1741_s23 = sshra.s32 %s1422_s17, 4  ;;  %s1742_s23 = int_to_ptr.hbm [resolvable:$true] %s1741_s23 }
 0x332   : > { %s1743_s25 = scalar_lea.hbm %s1742_s23, 128  ;;  %p1748_p0 = scmp.lt.s32.totalorder %s1742_s23, %s2456_s5 }
 0x333   : > { %p1744_p11 = scmp.ne.s32.totalorder %s1742_s23, %s1743_s25  ;;  %p1749_p1 = scmp.lt.s32.totalorder %s1747_s6, %s1743_s25 }
 0x335   : > { %p1745_p12 = pnand %p1744_p11, %p1864_p5  ;;  %p1750_p2 = por %p1749_p1, %p1748_p0 }
 0x337   : > { %1643 = vset.pattern.permute.xlu0 %v1793_v33  ;;  %p1746_p13 = pneg %p1745_p12 }
 0x338   : > { %1371 = vperm.xlu0 %1643, %v1725_v18   ;;  %v1340_v22 = vpop.permute.xlu2 %1339 }
 0x339   : > { %v1188_v37 = vpop.permute.xlu1 %1187  ;;  %1212 = vperm.xlu2 %1638, %v1089_v51   ;;  %p1751_p3 = pnand %p1750_p2, %p1746_p13 }
 0x33a   : > { %v1261_v39 = vmul.f32 %v1188_v37, %v2159_v59 }
 0x33c   : > { %v1278_v63 = vmul.f32 %v2324_v29, %v1261_v39 }
 0x33e   : > { %v1295_v49 = vadd.f32 %v2332_v60, %v1278_v63 }
 0x340   : > { %v1375_v35 = vmul.f32 %v2276_v38, %v1295_v49  ;;  %v1174_v38 = vsub.f32 1.5, %v1173_v10 }
 0x341   : > { %1227 = vperm.xlu2 %1638, %v1119_v0   ;;  %v1193_v59 = vpop.permute.xlu0 %1192 }
 0x342   : > { %1391 = vst [vmem:[%s2342_s12 + $0x8] sm:$0xff] %v1375_v35  ;;  %v1262_v55 = vmul.f32 %v1193_v59, %v2164_v1  ;;  %v1175_v34 = vmul.f32 %v1710_v30, %v1174_v38 }
 0x344   : > { %v1279_v57 = vmul.f32 %v2324_v29, %v1262_v55  ;;  %v1179_v1 = vsel %vm1178_vm0, %v1710_v30, %v1175_v34 }
 0x346   : > { %v1296_v62 = vadd.f32 %v2332_v60, %v1279_v57 }
 0x348   : > { %v1376_v4 = vmul.f32 %v1320_v21, %v1296_v62 }
 0x349   : > { %1242 = vperm.xlu2 %1638, %v1149_v3  }
 0x34a   : > { %1392 = vst [vmem:[%s2342_s12 + $0x10] sm:$0xff] %v1376_v4 }
 0x351   : > { %v1203_v48 = vpop.permute.xlu1 %1202  ;;  %1257 = vperm.xlu2 %1638, %v1179_v1  }
 0x352   : > { %v1264_v31 = vmul.f32 %v1203_v48, %v2174_v5 }
 0x354   : > { %v1281_v52 = vmul.f32 %v2324_v29, %v1264_v31 }
 0x356   : > { %v1298_v8 = vadd.f32 %v2332_v60, %v1281_v52 }
 0x358   : > { %v1378_v13 = vmul.f32 %v1328_v61, %v1298_v8 }
 0x359   : > { %1641 = vset.pattern.permute.xlu2 %v1793_v33  ;;  %v1208_v47 = vpop.permute.xlu0 %1207 }
 0x35a   : > { %1394 = vst [vmem:[%s2342_s12 + $0x20] sm:$0xff] %v1378_v13  ;;  %v1265_v11 = vmul.f32 %v1208_v47, %v2179_v12  ;;  %1363 = vperm.xlu2 %1641, %v1726_v42  }
 0x35c   : > { %v1282_v26 = vmul.f32 %v2324_v29, %v1265_v11 }
 0x35e   : > { %v1299_v5 = vadd.f32 %v2332_v60, %v1282_v26 }
 0x360   : > { %v1379_v16 = vmul.f32 %v2282_v15, %v1299_v5 }
 0x362   : > { %1395 = vst [vmem:[%s2342_s12 + $0x28] sm:$0xff] %v1379_v16 }
 0x369   : > { %v1218_v28 = vpop.permute.xlu1 %1217 }
 0x36a   : > { %v1267_v51 = vmul.f32 %v1218_v28, %v2189_v19  ;;  %v1352_v19 = vpop.permute.xlu2 %1351 }
 0x36c   : > { %v1284_v33 = vmul.f32 %v2324_v29, %v1267_v51 }
 0x36e   : > { %v1301_v18 = vadd.f32 %v2332_v60, %v1284_v33 }
 0x370   : > { %v1381_v30 = vmul.f32 %v1340_v22, %v1301_v18 }
 0x371   : > { %v1223_v12 = vpop.permute.xlu0 %1222 }
 0x372   : > { %1397 = vst [vmem:[%s2342_s12 + $0x38] sm:$0xff] %v1381_v30  ;;  %v1268_v37 = vmul.f32 %v1223_v12, %v2194_v20 }
 0x374   : > { %v1285_v39 = vmul.f32 %v2324_v29, %v1268_v37 }
 0x376   : > { %v1302_v25 = vadd.f32 %v2332_v60, %v1285_v39 }
 0x378   : > { %v1382_v15 = vmul.f32 %v2294_v41, %v1302_v25 }
 0x37a   : > { %1398 = vst [vmem:[%s2342_s12 + $0x40] sm:$0xff] %v1382_v15 }
 0x381   : > { %v1233_v43 = vpop.permute.xlu1 %1232 }
 0x382   : > { %v1270_v63 = vmul.f32 %v1233_v43, %v2204_v27 }
 0x383   : > { %v1183_v44 = vpop.permute.xlu2 %1182 }
 0x384   : > { %v1287_v49 = vmul.f32 %v2324_v29, %v1270_v63  ;;  %v1260_v53 = vmul.f32 %v1183_v44, %v2239_v45 }
 0x386   : > { %v1304_v20 = vadd.f32 %v2332_v60, %v1287_v49  ;;  %v1277_v35 = vmul.f32 %v2324_v29, %v1260_v53 }
 0x388   : > { %v1384_v0 = vmul.f32 %v1352_v19, %v1304_v20  ;;  %v1294_v50 = vadd.f32 %v2332_v60, %v1277_v35 }
 0x389   : > { %v1238_v41 = vpop.permute.xlu0 %1237 }
 0x38a   : > { %1400 = vst [vmem:[%s2342_s12 + $0x50] sm:$0xff] %v1384_v0  ;;  %v1374_v59 = vmul.f32 %v2263_v7, %v1294_v50  ;;  %v1271_v27 = vmul.f32 %v1238_v41, %v2209_v23 }
 0x38b   : > { %v1198_v55 = vpop.permute.xlu2 %1197 }
 0x38c   : > { %1390 = vst [vmem:[%s2342_s12] sm:$0xff] %v1374_v59  ;;  %v1288_v45 = vmul.f32 %v2324_v29, %v1271_v27  ;;  %v1263_v10 = vmul.f32 %v1198_v55, %v2169_v6 }
 0x38e   : > { %v1305_v57 = vadd.f32 %v2332_v60, %v1288_v45  ;;  %v1280_v58 = vmul.f32 %v2324_v29, %v1263_v10 }
 0x390   : > { %v1385_v21 = vmul.f32 %v2308_v17, %v1305_v57  ;;  %v1297_v62 = vadd.f32 %v2332_v60, %v1280_v58 }
 0x392   : > { %1401 = vst [vmem:[%s2342_s12 + $0x58] sm:$0xff] %v1385_v21  ;;  %v1377_v7 = vmul.f32 %v2269_v54, %v1297_v62 }
 0x393   : > { %v1213_v38 = vpop.permute.xlu2 %1212 }
 0x394   : > { %1393 = vst [vmem:[%s2342_s12 + $0x18] sm:$0xff] %v1377_v7  ;;  %v1266_v23 = vmul.f32 %v1213_v38, %v2184_v14 }
 0x396   : > { %v1283_v4 = vmul.f32 %v2324_v29, %v1266_v23 }
 0x398   : > { %v1300_v6 = vadd.f32 %v2332_v60, %v1283_v4 }
 0x399   : > { %v1248_v1 = vpop.permute.xlu1 %1247 }
 0x39a   : > { %v1380_v3 = vmul.f32 %v2292_v36, %v1300_v6 }
 0x39b   : > { %v1228_v34 = vpop.permute.xlu2 %1227 }
 0x39c   : > { %1396 = vst [vmem:[%s2342_s12 + $0x30] sm:$0xff] %v1380_v3  ;;  %v1269_v17 = vmul.f32 %v1228_v34, %v2199_v24 }
 0x39e   : > { %v1286_v48 = vmul.f32 %v2324_v29, %v1269_v17 }
 0x3a0   : > { %v1303_v54 = vadd.f32 %v2332_v60, %v1286_v48 }
 0x3a1   : > { %v1253_v31 = vpop.permute.xlu0 %1252 }
 0x3a2   : > { %v1383_v14 = vmul.f32 %v2303_v9, %v1303_v54  ;;  %v1274_v52 = vmul.f32 %v1253_v31, %v2236_v46  ;;  %v1368_v24 = vpop.permute.xlu1 %1367  ;;  %v1273_v46 = vmul.f32 %v1248_v1, %v2228_v40 }
 0x3a3   : > { %v1243_v8 = vpop.permute.xlu2 %1242 }
 0x3a4   : > { %1399 = vst [vmem:[%s2342_s12 + $0x48] sm:$0xff] %v1383_v14  ;;  %v1291_v36 = vmul.f32 %v2324_v29, %v1274_v52  ;;  %v1272_v61 = vmul.f32 %v1243_v8, %v2220_v32  ;;  %v1290_v16 = vmul.f32 %v2324_v29, %v1273_v46 }
 0x3a6   : > { %v1289_v13 = vmul.f32 %v2324_v29, %v1272_v61  ;;  %v1308_v47 = vadd.f32 %v2332_v60, %v1291_v36  ;;  %v1307_v51 = vadd.f32 %v2332_v60, %v1290_v16 }
 0x3a8   : > { %v1306_v11 = vadd.f32 %v2332_v60, %v1289_v13  ;;  %v1388_v42 = vmul.f32 %v1368_v24, %v1308_v47 }
 0x3aa   : > { %v1386_v9 = vmul.f32 %v2318_v2, %v1306_v11  ;;  %1404 = vst [vmem:[%s2342_s12 + $0x70] sm:$0xff] %v1388_v42  ;;  %v1372_v2 = vpop.permute.xlu0 %1371 }
 0x3ab   : > { %v1258_v26 = vpop.permute.xlu2 %1257 }
 0x3ac   : > { %1402 = vst [vmem:[%s2342_s12 + $0x60] sm:$0xff] %v1386_v9  ;;  %v1275_v32 = vmul.f32 %v1258_v26, %v2249_v56 }
 0x3ae   : > { %v1292_v5 = vmul.f32 %v2324_v29, %v1275_v32 }
 0x3b0   : > { %v1309_v28 = vadd.f32 %v2332_v60, %v1292_v5 }
 0x3b2   : > { %v1389_v40 = vmul.f32 %v1372_v2, %v1309_v28 }
 0x3b4   : > { %1405 = vst [vmem:[%s2342_s12 + $0x78] sm:$0xff] %v1389_v40  ;;  %v1364_v56 = vpop.permute.xlu2 %1363 }
 0x3b5   : > { %v1387_v33 = vmul.f32 %v1364_v56, %v1307_v51 }
 0x3b7   : > { %1403 = vst [vmem:[%s2342_s12 + $0x68] sm:$0xff] %v1387_v33 }
 0x3b8   : > { %1754 = shalt.err (!%p1751_p3)
}
 0x3b9   : > { %s1794_s7 = smov 128   ;;  %s1795_s11 = smov 8  }
 0x3ba   : > { %1588 = dma.vmem_to_hbm [thread:$0]  (%p1864_p5), %s1420_s16, 2048, %s1422_s17, %s1407_s22, %s1794_s7, %s1794_s7, %s1795_s11  }
 0x3bb PF: > { %p1594_p4 = scmp.ge.s32.totalorder %s1789_s21, 2  ;;  %s1436_s12 = sand.u32 1, %s1777_s18  }
 0x3bc   : > { %s1437_s10 = scalar_lea.sflag [#allocation3], %s1436_s12 }
 0x3bd   : > { %p1591_p7 = pnand %p1594_p4, %p1868_p6 }
 0x3bf   : > { %p1592_p8 = pneg %p1591_p7 }
 0x3c1   : > { %1772 = dma.done.wait (%p1592_p8), %s1437_s10, 2048  }
 0x3c2   : > { %1774 = vsyncadd (%p1592_p8), %s1437_s10, 4294965248  ;;  %p15_p9 = scmp.ge.s32.totalorder %s1851_s24, 4   ;;  %s2459_s18 = smov %s1781_s19 }
 0x3c3   : > { %s2460_s19 = smov %s1785_s20  ;;  %s2461_s20 = smov %s1862_s27 }
 0x3c4   : > { %s2462_s21 = smov %s1851_s24  ;;  %17 = sbr.rel (!%p15_p9) target bundleno = 3 (0x3), region = 81 }
 0x3c9   :  { %1443 = vsyncpa [#allocation3], 1 }
 0x3ca   :  { %1445 = vsyncpa [#allocation3 + $0x1], 1 }

</bundles_post_ra>
